<compile_context>
chip_gen: v5e
topology: v5e:2x2
jax: 0.10.0
libtpu: 0.0.40
codegen_flags: <defaults>
</compile_context>

<pallas_src>
import functools
import math

import jax
import jax.numpy as jnp
from jax.experimental import pallas as pl
from jax.experimental.pallas import tpu as pltpu


# ------------------------------ Pallas kernel ------------------------------

def _my_conv2d_kernel(H, W, x_ref, w1_ref, wd3_ref, wd5_ref, wd7_ref,
                      ecaM_ref, o_ref):
    HW = H * W
    CI = w1_ref.shape[0]          # inter channels = out_ch // 4
    CO = o_ref.shape[1]           # 4 * CI

    # Lane index / column-within-row index for the zero-padding masks.
    col = jax.lax.broadcasted_iota(jnp.int32, (1, HW), 1)
    wcol = col % W

    def im2col(prev):
        """prev: (CI, HW) f32 -> (9*CI, HW) bf16 patch.

        Tap (dh, dw) of the 3x3 depthwise window is a lane roll of the flat-HW
        layout by dh*W + dw, with rows/columns that would read the zero pad
        masked to 0 (the masks also kill the roll's wrap-around values)."""
        taps = []
        for dh in (-1, 0, 1):
            for dw in (-1, 0, 1):
                s = dh * W + dw                    # want result[p] = prev[p+s]
                if s == 0:
                    t = prev
                else:
                    t = pltpu.roll(prev, (-s) % HW, axis=1)
                mask = None
                if dh == -1:
                    mask = col >= W
                elif dh == 1:
                    mask = col < (H - 1) * W
                if dw == -1:
                    m = wcol >= 1
                    mask = m if mask is None else jnp.logical_and(mask, m)
                elif dw == 1:
                    m = wcol < (W - 1)
                    mask = m if mask is None else jnp.logical_and(mask, m)
                if mask is not None:
                    t = jnp.where(mask, t, 0.0)
                taps.append(t)
        # Sublane-axis concat of 16-row (sublane-aligned) blocks -> (144, HW).
        return jnp.concatenate(taps, axis=0).astype(jnp.bfloat16)

    # ---- 1x1 conv: (CI, Cin) @ (Cin, HW) on the MXU, f32 accumulation ----
    x = x_ref[0]                                                  # (Cin, HW) bf16
    out1 = jnp.dot(w1_ref[...], x, preferred_element_type=jnp.float32)

    # ---- 3 chained DSC stages, each a single K=9*CI matmul ----
    def dsc(prev, wd_ref):
        return jnp.dot(wd_ref[...], im2col(prev),
                       preferred_element_type=jnp.float32)        # (CI, HW)

    out3 = dsc(out1, wd3_ref)
    out5 = dsc(out3, wd5_ref)
    out7 = dsc(out5, wd7_ref)

    # ---- channel concat = sublane-aligned slice stores into the out block ----
    o_ref[0, 0 * CI:1 * CI, :] = out1
    o_ref[0, 1 * CI:2 * CI, :] = out3
    o_ref[0, 2 * CI:3 * CI, :] = out5
    o_ref[0, 3 * CI:4 * CI, :] = out7

    # ---- ECA: GAP + banded Conv1d fused into one matmul, sigmoid, scale ----
    cat = o_ref[0]                                                # (CO, HW) f32
    # ecaM is the (CO, CO) band matrix already scaled by 1/HW, so
    # sum_lanes(ecaM @ cat) == band_conv1d(mean_{h,w}(cat)).
    z = jnp.dot(ecaM_ref[...], cat, preferred_element_type=jnp.float32)
    gate = jax.nn.sigmoid(jnp.sum(z, axis=1, keepdims=True))      # (CO, 1)
    o_ref[0] = cat * gate


# ------------------------------- JAX wrapper --------------------------------

def eca_band_matrix(w_eca, channels):
    """(C, C) matrix M with M[i, j] = w[j - i + p] (zero outside the band), so
    M @ y (column y) == nn.Conv1d(1, 1, k, padding=(k-1)//2, bias=False)."""
    k = w_eca.shape[0]
    p = (k - 1) // 2
    i = jnp.arange(channels)[:, None]
    j = jnp.arange(channels)[None, :]
    t = j - i + p
    valid = (t >= 0) & (t < k)
    return jnp.where(valid, w_eca[jnp.clip(t, 0, k - 1)], 0.0).astype(jnp.float32)


def _fold_dsc(dw, pw):
    """Fold depthwise (3,3,CI) and pointwise (CI_in, CI_out) into one im2col
    matmul weight of shape (CI_out, 9*CI_in):  W[o, (di*3+dj)*CI + c] =
    dw[di, dj, c] * pw[c, o]."""
    ci = dw.shape[-1]
    w = jnp.einsum("ijc,co->oijc", dw, pw).reshape(ci, 9 * ci)
    return w.astype(jnp.bfloat16)


def my_conv2d_forward(params, x_nchw):
    """Fused my_Conv2d forward. x_nchw: (B, Cin, H, W) -> (B, out_ch, H, W)."""
    B, Cin, H, W = x_nchw.shape
    HW = H * W
    CI = params["w1"].shape[1]
    CO = 4 * CI

    # NCHW is already channels-major; just flatten H*W onto the lane axis.
    x = x_nchw.reshape(B, Cin, HW).astype(jnp.bfloat16)
    w1 = params["w1"].T.astype(jnp.bfloat16)                      # (CI, Cin)
    wd3 = _fold_dsc(params["dw3"], params["pw3"])                 # (CI, 9*CI)
    wd5 = _fold_dsc(params["dw5"], params["pw5"])
    wd7 = _fold_dsc(params["dw7"], params["pw7"])
    ecaM = eca_band_matrix(params["eca"], CO) * (1.0 / HW)        # (CO, CO)

    kernel = functools.partial(_my_conv2d_kernel, H, W)
    full = lambda b: (0, 0)

    out = pl.pallas_call(
        kernel,
        out_shape=jax.ShapeDtypeStruct((B, CO, HW), jnp.float32),
        grid=(B,),
        in_specs=[
            pl.BlockSpec((1, Cin, HW), lambda b: (b, 0, 0)),      # x (bf16)
            pl.BlockSpec((CI, Cin), full),                        # 1x1 weight
            pl.BlockSpec((CI, 9 * CI), full),                     # folded DSC 3
            pl.BlockSpec((CI, 9 * CI), full),                     # folded DSC 5
            pl.BlockSpec((CI, 9 * CI), full),                     # folded DSC 7
            pl.BlockSpec((CO, CO), full),                         # ECA band / HW
        ],
        out_specs=pl.BlockSpec((1, CO, HW), lambda b: (b, 0, 0)),
        compiler_params=pltpu.CompilerParams(
            dimension_semantics=("parallel",)),
    )(x, w1, wd3, wd5, wd7, ecaM)

    return out.reshape(B, CO, H, W)                               # already NCHW


# --------------------------- pure-JAX reference -----------------------------

def my_conv2d_ref(params, x_nchw):
    x = jnp.transpose(x_nchw, (0, 2, 3, 1)).astype(jnp.float32)   # NHWC
    B, H, W, _ = x.shape

    def pw(h, wmat):
        return jnp.einsum("bhwi,io->bhwo", h, wmat)

    def dw3x3(h, wdw):
        hp = jnp.pad(h, ((0, 0), (1, 1), (1, 1), (0, 0)))
        acc = jnp.zeros_like(h)
        for di in range(3):
            for dj in range(3):
                acc = acc + hp[:, di:di + H, dj:dj + W, :] * wdw[di, dj]
        return acc

    out1 = pw(x, params["w1"])
    out3 = pw(dw3x3(out1, params["dw3"]), params["pw3"])
    out5 = pw(dw3x3(out3, params["dw5"]), params["pw5"])
    out7 = pw(dw3x3(out5, params["dw7"]), params["pw7"])
    cat = jnp.concatenate([out1, out3, out5, out7], axis=-1)
    CO = cat.shape[-1]
    y = jnp.mean(cat, axis=(1, 2))                                # (B, CO)
    yc = y @ eca_band_matrix(params["eca"], CO).T
    gate = jax.nn.sigmoid(yc)
    out = cat * gate[:, None, None, :]
    return jnp.transpose(out, (0, 3, 1, 2))


# ------------------------------ parameter init ------------------------------

def eca_ksize(channels):
    k = math.ceil(math.log(channels, 2) / 2 + 0.5)
    if k % 2 == 0:
        k -= 1
    return k


def make_my_conv2d_params(key, in_ch, out_ch):
    inter = out_ch // 4
    k = eca_ksize(out_ch)
    keys = jax.random.split(key, 8)

    def init(kk, shape, fan_in):
        return jax.random.normal(kk, shape, jnp.float32) * (1.0 / math.sqrt(fan_in))

    return {
        "w1": init(keys[0], (in_ch, inter), in_ch),   # 1x1 conv  (Cin, inter)
        "dw3": init(keys[1], (3, 3, inter), 9),       # depthwise (3, 3, inter)
        "pw3": init(keys[2], (inter, inter), inter),  # pointwise (in, out)
        "dw5": init(keys[3], (3, 3, inter), 9),
        "pw5": init(keys[4], (inter, inter), inter),
        "dw7": init(keys[5], (3, 3, inter), 9),
        "pw7": init(keys[6], (inter, inter), inter),
        "eca": init(keys[7], (k,), k),                # Conv1d(1,1,k) weight
    }


# ----------------------------------- main -----------------------------------

if __name__ == "__main__":
    B, Cin, H, W = 2, 8, 16, 16
    out_ch = 64

    key = jax.random.PRNGKey(0)
    kp, kx = jax.random.split(key)
    params = make_my_conv2d_params(kp, Cin, out_ch)
    x = jax.random.normal(kx, (B, Cin, H, W), dtype=jnp.float32)

    fwd = jax.jit(my_conv2d_forward)
    out = jax.block_until_ready(fwd(params, x))

    assert out.shape == (B, out_ch, H, W), out.shape
    assert bool(jnp.all(jnp.isfinite(out)))

    ref = my_conv2d_ref(params, x)
    max_err = float(jnp.max(jnp.abs(out - ref)))
    assert max_err < 1e-1, f"max abs err vs reference: {max_err}"

    print("KERNEL_OK")
</pallas_src>

<mosaic_0001>
module attributes {stable_mosaic.version = 11 : i64} {
  func.func @_my_conv2d_kernel(%arg0: i32, %arg1: memref<1x8x256xbf16, #tpu.memory_space<vmem>>, %arg2: memref<16x8xbf16, #tpu.memory_space<vmem>>, %arg3: memref<16x144xbf16, #tpu.memory_space<vmem>>, %arg4: memref<16x144xbf16, #tpu.memory_space<vmem>>, %arg5: memref<16x144xbf16, #tpu.memory_space<vmem>>, %arg6: memref<64x64xf32, #tpu.memory_space<vmem>>, %arg7: memref<1x64x256xf32, #tpu.memory_space<vmem>>) attributes {dimension_semantics = [#tpu.dimension_semantics<parallel>], iteration_bounds = array<i64: 2>, scalar_prefetch = 0 : i64, scratch_operands = 0 : i64, tpu.core_type = #tpu.core_type<tc>, window_params = [{transform_indices = @transform_0, window_bounds = array<i64: 1, 8, 256>}, {pipeline_mode = #tpu.pipeline_mode<synchronous>, transform_indices = @transform_1, window_bounds = array<i64: 16, 8>}, {pipeline_mode = #tpu.pipeline_mode<synchronous>, transform_indices = @transform_2, window_bounds = array<i64: 16, 144>}, {pipeline_mode = #tpu.pipeline_mode<synchronous>, transform_indices = @transform_3, window_bounds = array<i64: 16, 144>}, {pipeline_mode = #tpu.pipeline_mode<synchronous>, transform_indices = @transform_4, window_bounds = array<i64: 16, 144>}, {pipeline_mode = #tpu.pipeline_mode<synchronous>, transform_indices = @transform_5, window_bounds = array<i64: 64, 64>}, {transform_indices = @transform_6, window_bounds = array<i64: 1, 64, 256>}]} {
    %0 = tpu.iota {dimensions = array<i32: 1>} : vector<1x256xi32>
    %c16_i32 = arith.constant 16 : i32
    %c0_i32 = arith.constant 0 : i32
    %1 = arith.cmpi eq, %c16_i32, %c0_i32 : i32
    %c1_i32 = arith.constant 1 : i32
    %2 = arith.select %1, %c1_i32, %c16_i32 : i32
    %3 = vector.broadcast %2 : i32 to vector<1x256xi32>
    %4 = arith.remsi %0, %3 : vector<1x256xi32>
    %c0_i32_0 = arith.constant 0 : i32
    %5 = vector.broadcast %c0_i32_0 : i32 to vector<1x256xi32>
    %6 = arith.cmpi ne, %4, %5 : vector<1x256xi32>
    %c0_i32_1 = arith.constant 0 : i32
    %7 = vector.broadcast %c0_i32_1 : i32 to vector<1x256xi32>
    %8 = arith.cmpi slt, %4, %7 : vector<1x256xi32>
    %c0_i32_2 = arith.constant 0 : i32
    %9 = arith.cmpi slt, %2, %c0_i32_2 : i32
    %10 = vector.broadcast %9 : i1 to vector<1x256xi1>
    %11 = vector.broadcast %10 : vector<1x256xi1> to vector<1x256xi1>
    %12 = arith.xori %8, %11 : vector<1x256xi1>
    %13 = arith.andi %12, %6 : vector<1x256xi1>
    %14 = vector.broadcast %2 : i32 to vector<1x256xi32>
    %15 = arith.addi %4, %14 : vector<1x256xi32>
    %16 = arith.select %13, %15, %4 : vector<1x256xi1>, vector<1x256xi32>
    %c0 = arith.constant 0 : index
    %c0_3 = arith.constant 0 : index
    %c0_4 = arith.constant 0 : index
    %17 = vector.load %arg1[%c0, %c0_3, %c0_4] : memref<1x8x256xbf16, #tpu.memory_space<vmem>>, vector<1x8x256xbf16>
    %18 = vector.shape_cast %17 : vector<1x8x256xbf16> to vector<8x256xbf16>
    %c0_5 = arith.constant 0 : index
    %c0_6 = arith.constant 0 : index
    %19 = vector.load %arg2[%c0_5, %c0_6] : memref<16x8xbf16, #tpu.memory_space<vmem>>, vector<16x8xbf16>
    %cst = arith.constant dense<0.000000e+00> : vector<16x256xf32>
    %20 = tpu.matmul %19, %18, %cst {dimension_numbers = #tpu.dot_dimension_numbers<[1], [0], [0], [1], [0, 0, 1, 1], [], []>} : vector<16x8xbf16>, vector<8x256xbf16>, vector<16x256xf32> -> vector<16x256xf32>
    %c0_7 = arith.constant 0 : index
    %c0_8 = arith.constant 0 : index
    %21 = vector.load %arg3[%c0_7, %c0_8] : memref<16x144xbf16, #tpu.memory_space<vmem>>, vector<16x144xbf16>
    %c17_i32 = arith.constant 17 : i32
    %22 = tpu.dynamic_rotate %20 by %c17_i32 dim 1 : vector<16x256xf32>, i32 -> vector<16x256xf32>
    %c16_i32_9 = arith.constant 16 : i32
    %23 = vector.broadcast %c16_i32_9 : i32 to vector<1x256xi32>
    %24 = arith.cmpi sge, %0, %23 : vector<1x256xi32>
    %c1_i32_10 = arith.constant 1 : i32
    %25 = vector.broadcast %c1_i32_10 : i32 to vector<1x256xi32>
    %26 = arith.cmpi sge, %16, %25 : vector<1x256xi32>
    %27 = arith.andi %24, %26 : vector<1x256xi1>
    %cst_11 = arith.constant 0.000000e+00 : f32
    %28 = vector.shape_cast %27 : vector<1x256xi1> to vector<1x256xi1>
    %29 = vector.broadcast %28 : vector<1x256xi1> to vector<16x256xi1>
    %30 = vector.broadcast %cst_11 : f32 to vector<16x256xf32>
    %31 = arith.select %29, %22, %30 : vector<16x256xi1>, vector<16x256xf32>
    %c16_i32_12 = arith.constant 16 : i32
    %32 = tpu.dynamic_rotate %20 by %c16_i32_12 dim 1 : vector<16x256xf32>, i32 -> vector<16x256xf32>
    %c16_i32_13 = arith.constant 16 : i32
    %33 = vector.broadcast %c16_i32_13 : i32 to vector<1x256xi32>
    %34 = arith.cmpi sge, %0, %33 : vector<1x256xi32>
    %cst_14 = arith.constant 0.000000e+00 : f32
    %35 = vector.shape_cast %34 : vector<1x256xi1> to vector<1x256xi1>
    %36 = vector.broadcast %35 : vector<1x256xi1> to vector<16x256xi1>
    %37 = vector.broadcast %cst_14 : f32 to vector<16x256xf32>
    %38 = arith.select %36, %32, %37 : vector<16x256xi1>, vector<16x256xf32>
    %c15_i32 = arith.constant 15 : i32
    %39 = tpu.dynamic_rotate %20 by %c15_i32 dim 1 : vector<16x256xf32>, i32 -> vector<16x256xf32>
    %c16_i32_15 = arith.constant 16 : i32
    %40 = vector.broadcast %c16_i32_15 : i32 to vector<1x256xi32>
    %41 = arith.cmpi sge, %0, %40 : vector<1x256xi32>
    %c15_i32_16 = arith.constant 15 : i32
    %42 = vector.broadcast %c15_i32_16 : i32 to vector<1x256xi32>
    %43 = arith.cmpi slt, %16, %42 : vector<1x256xi32>
    %44 = arith.andi %41, %43 : vector<1x256xi1>
    %cst_17 = arith.constant 0.000000e+00 : f32
    %45 = vector.shape_cast %44 : vector<1x256xi1> to vector<1x256xi1>
    %46 = vector.broadcast %45 : vector<1x256xi1> to vector<16x256xi1>
    %47 = vector.broadcast %cst_17 : f32 to vector<16x256xf32>
    %48 = arith.select %46, %39, %47 : vector<16x256xi1>, vector<16x256xf32>
    %c1_i32_18 = arith.constant 1 : i32
    %49 = tpu.dynamic_rotate %20 by %c1_i32_18 dim 1 : vector<16x256xf32>, i32 -> vector<16x256xf32>
    %c1_i32_19 = arith.constant 1 : i32
    %50 = vector.broadcast %c1_i32_19 : i32 to vector<1x256xi32>
    %51 = arith.cmpi sge, %16, %50 : vector<1x256xi32>
    %cst_20 = arith.constant 0.000000e+00 : f32
    %52 = vector.shape_cast %51 : vector<1x256xi1> to vector<1x256xi1>
    %53 = vector.broadcast %52 : vector<1x256xi1> to vector<16x256xi1>
    %54 = vector.broadcast %cst_20 : f32 to vector<16x256xf32>
    %55 = arith.select %53, %49, %54 : vector<16x256xi1>, vector<16x256xf32>
    %c255_i32 = arith.constant 255 : i32
    %56 = tpu.dynamic_rotate %20 by %c255_i32 dim 1 : vector<16x256xf32>, i32 -> vector<16x256xf32>
    %c15_i32_21 = arith.constant 15 : i32
    %57 = vector.broadcast %c15_i32_21 : i32 to vector<1x256xi32>
    %58 = arith.cmpi slt, %16, %57 : vector<1x256xi32>
    %cst_22 = arith.constant 0.000000e+00 : f32
    %59 = vector.shape_cast %58 : vector<1x256xi1> to vector<1x256xi1>
    %60 = vector.broadcast %59 : vector<1x256xi1> to vector<16x256xi1>
    %61 = vector.broadcast %cst_22 : f32 to vector<16x256xf32>
    %62 = arith.select %60, %56, %61 : vector<16x256xi1>, vector<16x256xf32>
    %c241_i32 = arith.constant 241 : i32
    %63 = tpu.dynamic_rotate %20 by %c241_i32 dim 1 : vector<16x256xf32>, i32 -> vector<16x256xf32>
    %c240_i32 = arith.constant 240 : i32
    %64 = vector.broadcast %c240_i32 : i32 to vector<1x256xi32>
    %65 = arith.cmpi slt, %0, %64 : vector<1x256xi32>
    %c1_i32_23 = arith.constant 1 : i32
    %66 = vector.broadcast %c1_i32_23 : i32 to vector<1x256xi32>
    %67 = arith.cmpi sge, %16, %66 : vector<1x256xi32>
    %68 = arith.andi %65, %67 : vector<1x256xi1>
    %cst_24 = arith.constant 0.000000e+00 : f32
    %69 = vector.shape_cast %68 : vector<1x256xi1> to vector<1x256xi1>
    %70 = vector.broadcast %69 : vector<1x256xi1> to vector<16x256xi1>
    %71 = vector.broadcast %cst_24 : f32 to vector<16x256xf32>
    %72 = arith.select %70, %63, %71 : vector<16x256xi1>, vector<16x256xf32>
    %c240_i32_25 = arith.constant 240 : i32
    %73 = tpu.dynamic_rotate %20 by %c240_i32_25 dim 1 : vector<16x256xf32>, i32 -> vector<16x256xf32>
    %c240_i32_26 = arith.constant 240 : i32
    %74 = vector.broadcast %c240_i32_26 : i32 to vector<1x256xi32>
    %75 = arith.cmpi slt, %0, %74 : vector<1x256xi32>
    %cst_27 = arith.constant 0.000000e+00 : f32
    %76 = vector.shape_cast %75 : vector<1x256xi1> to vector<1x256xi1>
    %77 = vector.broadcast %76 : vector<1x256xi1> to vector<16x256xi1>
    %78 = vector.broadcast %cst_27 : f32 to vector<16x256xf32>
    %79 = arith.select %77, %73, %78 : vector<16x256xi1>, vector<16x256xf32>
    %c239_i32 = arith.constant 239 : i32
    %80 = tpu.dynamic_rotate %20 by %c239_i32 dim 1 : vector<16x256xf32>, i32 -> vector<16x256xf32>
    %c240_i32_28 = arith.constant 240 : i32
    %81 = vector.broadcast %c240_i32_28 : i32 to vector<1x256xi32>
    %82 = arith.cmpi slt, %0, %81 : vector<1x256xi32>
    %c15_i32_29 = arith.constant 15 : i32
    %83 = vector.broadcast %c15_i32_29 : i32 to vector<1x256xi32>
    %84 = arith.cmpi slt, %16, %83 : vector<1x256xi32>
    %85 = arith.andi %82, %84 : vector<1x256xi1>
    %cst_30 = arith.constant 0.000000e+00 : f32
    %86 = vector.shape_cast %85 : vector<1x256xi1> to vector<1x256xi1>
    %87 = vector.broadcast %86 : vector<1x256xi1> to vector<16x256xi1>
    %88 = vector.broadcast %cst_30 : f32 to vector<16x256xf32>
    %89 = arith.select %87, %80, %88 : vector<16x256xi1>, vector<16x256xf32>
    %90 = tpu.concatenate %31, %38, %48, %55, %20, %62, %72, %79, %89 in 0 : vector<16x256xf32>, vector<16x256xf32>, vector<16x256xf32>, vector<16x256xf32>, vector<16x256xf32>, vector<16x256xf32>, vector<16x256xf32>, vector<16x256xf32>, vector<16x256xf32> -> vector<144x256xf32>
    %91 = arith.truncf %90 : vector<144x256xf32> to vector<144x256xbf16>
    %cst_31 = arith.constant dense<0.000000e+00> : vector<16x256xf32>
    %92 = tpu.matmul %21, %91, %cst_31 {dimension_numbers = #tpu.dot_dimension_numbers<[1], [0], [0], [1], [0, 0, 1, 1], [], []>} : vector<16x144xbf16>, vector<144x256xbf16>, vector<16x256xf32> -> vector<16x256xf32>
    %c0_32 = arith.constant 0 : index
    %c0_33 = arith.constant 0 : index
    %93 = vector.load %arg4[%c0_32, %c0_33] : memref<16x144xbf16, #tpu.memory_space<vmem>>, vector<16x144xbf16>
    %c17_i32_34 = arith.constant 17 : i32
    %94 = tpu.dynamic_rotate %92 by %c17_i32_34 dim 1 : vector<16x256xf32>, i32 -> vector<16x256xf32>
    %c16_i32_35 = arith.constant 16 : i32
    %95 = vector.broadcast %c16_i32_35 : i32 to vector<1x256xi32>
    %96 = arith.cmpi sge, %0, %95 : vector<1x256xi32>
    %c1_i32_36 = arith.constant 1 : i32
    %97 = vector.broadcast %c1_i32_36 : i32 to vector<1x256xi32>
    %98 = arith.cmpi sge, %16, %97 : vector<1x256xi32>
    %99 = arith.andi %96, %98 : vector<1x256xi1>
    %cst_37 = arith.constant 0.000000e+00 : f32
    %100 = vector.shape_cast %99 : vector<1x256xi1> to vector<1x256xi1>
    %101 = vector.broadcast %100 : vector<1x256xi1> to vector<16x256xi1>
    %102 = vector.broadcast %cst_37 : f32 to vector<16x256xf32>
    %103 = arith.select %101, %94, %102 : vector<16x256xi1>, vector<16x256xf32>
    %c16_i32_38 = arith.constant 16 : i32
    %104 = tpu.dynamic_rotate %92 by %c16_i32_38 dim 1 : vector<16x256xf32>, i32 -> vector<16x256xf32>
    %c16_i32_39 = arith.constant 16 : i32
    %105 = vector.broadcast %c16_i32_39 : i32 to vector<1x256xi32>
    %106 = arith.cmpi sge, %0, %105 : vector<1x256xi32>
    %cst_40 = arith.constant 0.000000e+00 : f32
    %107 = vector.shape_cast %106 : vector<1x256xi1> to vector<1x256xi1>
    %108 = vector.broadcast %107 : vector<1x256xi1> to vector<16x256xi1>
    %109 = vector.broadcast %cst_40 : f32 to vector<16x256xf32>
    %110 = arith.select %108, %104, %109 : vector<16x256xi1>, vector<16x256xf32>
    %c15_i32_41 = arith.constant 15 : i32
    %111 = tpu.dynamic_rotate %92 by %c15_i32_41 dim 1 : vector<16x256xf32>, i32 -> vector<16x256xf32>
    %c16_i32_42 = arith.constant 16 : i32
    %112 = vector.broadcast %c16_i32_42 : i32 to vector<1x256xi32>
    %113 = arith.cmpi sge, %0, %112 : vector<1x256xi32>
    %c15_i32_43 = arith.constant 15 : i32
    %114 = vector.broadcast %c15_i32_43 : i32 to vector<1x256xi32>
    %115 = arith.cmpi slt, %16, %114 : vector<1x256xi32>
    %116 = arith.andi %113, %115 : vector<1x256xi1>
    %cst_44 = arith.constant 0.000000e+00 : f32
    %117 = vector.shape_cast %116 : vector<1x256xi1> to vector<1x256xi1>
    %118 = vector.broadcast %117 : vector<1x256xi1> to vector<16x256xi1>
    %119 = vector.broadcast %cst_44 : f32 to vector<16x256xf32>
    %120 = arith.select %118, %111, %119 : vector<16x256xi1>, vector<16x256xf32>
    %c1_i32_45 = arith.constant 1 : i32
    %121 = tpu.dynamic_rotate %92 by %c1_i32_45 dim 1 : vector<16x256xf32>, i32 -> vector<16x256xf32>
    %c1_i32_46 = arith.constant 1 : i32
    %122 = vector.broadcast %c1_i32_46 : i32 to vector<1x256xi32>
    %123 = arith.cmpi sge, %16, %122 : vector<1x256xi32>
    %cst_47 = arith.constant 0.000000e+00 : f32
    %124 = vector.shape_cast %123 : vector<1x256xi1> to vector<1x256xi1>
    %125 = vector.broadcast %124 : vector<1x256xi1> to vector<16x256xi1>
    %126 = vector.broadcast %cst_47 : f32 to vector<16x256xf32>
    %127 = arith.select %125, %121, %126 : vector<16x256xi1>, vector<16x256xf32>
    %c255_i32_48 = arith.constant 255 : i32
    %128 = tpu.dynamic_rotate %92 by %c255_i32_48 dim 1 : vector<16x256xf32>, i32 -> vector<16x256xf32>
    %c15_i32_49 = arith.constant 15 : i32
    %129 = vector.broadcast %c15_i32_49 : i32 to vector<1x256xi32>
    %130 = arith.cmpi slt, %16, %129 : vector<1x256xi32>
    %cst_50 = arith.constant 0.000000e+00 : f32
    %131 = vector.shape_cast %130 : vector<1x256xi1> to vector<1x256xi1>
    %132 = vector.broadcast %131 : vector<1x256xi1> to vector<16x256xi1>
    %133 = vector.broadcast %cst_50 : f32 to vector<16x256xf32>
    %134 = arith.select %132, %128, %133 : vector<16x256xi1>, vector<16x256xf32>
    %c241_i32_51 = arith.constant 241 : i32
    %135 = tpu.dynamic_rotate %92 by %c241_i32_51 dim 1 : vector<16x256xf32>, i32 -> vector<16x256xf32>
    %c240_i32_52 = arith.constant 240 : i32
    %136 = vector.broadcast %c240_i32_52 : i32 to vector<1x256xi32>
    %137 = arith.cmpi slt, %0, %136 : vector<1x256xi32>
    %c1_i32_53 = arith.constant 1 : i32
    %138 = vector.broadcast %c1_i32_53 : i32 to vector<1x256xi32>
    %139 = arith.cmpi sge, %16, %138 : vector<1x256xi32>
    %140 = arith.andi %137, %139 : vector<1x256xi1>
    %cst_54 = arith.constant 0.000000e+00 : f32
    %141 = vector.shape_cast %140 : vector<1x256xi1> to vector<1x256xi1>
    %142 = vector.broadcast %141 : vector<1x256xi1> to vector<16x256xi1>
    %143 = vector.broadcast %cst_54 : f32 to vector<16x256xf32>
    %144 = arith.select %142, %135, %143 : vector<16x256xi1>, vector<16x256xf32>
    %c240_i32_55 = arith.constant 240 : i32
    %145 = tpu.dynamic_rotate %92 by %c240_i32_55 dim 1 : vector<16x256xf32>, i32 -> vector<16x256xf32>
    %c240_i32_56 = arith.constant 240 : i32
    %146 = vector.broadcast %c240_i32_56 : i32 to vector<1x256xi32>
    %147 = arith.cmpi slt, %0, %146 : vector<1x256xi32>
    %cst_57 = arith.constant 0.000000e+00 : f32
    %148 = vector.shape_cast %147 : vector<1x256xi1> to vector<1x256xi1>
    %149 = vector.broadcast %148 : vector<1x256xi1> to vector<16x256xi1>
    %150 = vector.broadcast %cst_57 : f32 to vector<16x256xf32>
    %151 = arith.select %149, %145, %150 : vector<16x256xi1>, vector<16x256xf32>
    %c239_i32_58 = arith.constant 239 : i32
    %152 = tpu.dynamic_rotate %92 by %c239_i32_58 dim 1 : vector<16x256xf32>, i32 -> vector<16x256xf32>
    %c240_i32_59 = arith.constant 240 : i32
    %153 = vector.broadcast %c240_i32_59 : i32 to vector<1x256xi32>
    %154 = arith.cmpi slt, %0, %153 : vector<1x256xi32>
    %c15_i32_60 = arith.constant 15 : i32
    %155 = vector.broadcast %c15_i32_60 : i32 to vector<1x256xi32>
    %156 = arith.cmpi slt, %16, %155 : vector<1x256xi32>
    %157 = arith.andi %154, %156 : vector<1x256xi1>
    %cst_61 = arith.constant 0.000000e+00 : f32
    %158 = vector.shape_cast %157 : vector<1x256xi1> to vector<1x256xi1>
    %159 = vector.broadcast %158 : vector<1x256xi1> to vector<16x256xi1>
    %160 = vector.broadcast %cst_61 : f32 to vector<16x256xf32>
    %161 = arith.select %159, %152, %160 : vector<16x256xi1>, vector<16x256xf32>
    %162 = tpu.concatenate %103, %110, %120, %127, %92, %134, %144, %151, %161 in 0 : vector<16x256xf32>, vector<16x256xf32>, vector<16x256xf32>, vector<16x256xf32>, vector<16x256xf32>, vector<16x256xf32>, vector<16x256xf32>, vector<16x256xf32>, vector<16x256xf32> -> vector<144x256xf32>
    %163 = arith.truncf %162 : vector<144x256xf32> to vector<144x256xbf16>
    %cst_62 = arith.constant dense<0.000000e+00> : vector<16x256xf32>
    %164 = tpu.matmul %93, %163, %cst_62 {dimension_numbers = #tpu.dot_dimension_numbers<[1], [0], [0], [1], [0, 0, 1, 1], [], []>} : vector<16x144xbf16>, vector<144x256xbf16>, vector<16x256xf32> -> vector<16x256xf32>
    %c0_63 = arith.constant 0 : index
    %c0_64 = arith.constant 0 : index
    %165 = vector.load %arg5[%c0_63, %c0_64] : memref<16x144xbf16, #tpu.memory_space<vmem>>, vector<16x144xbf16>
    %c17_i32_65 = arith.constant 17 : i32
    %166 = tpu.dynamic_rotate %164 by %c17_i32_65 dim 1 : vector<16x256xf32>, i32 -> vector<16x256xf32>
    %c16_i32_66 = arith.constant 16 : i32
    %167 = vector.broadcast %c16_i32_66 : i32 to vector<1x256xi32>
    %168 = arith.cmpi sge, %0, %167 : vector<1x256xi32>
    %c1_i32_67 = arith.constant 1 : i32
    %169 = vector.broadcast %c1_i32_67 : i32 to vector<1x256xi32>
    %170 = arith.cmpi sge, %16, %169 : vector<1x256xi32>
    %171 = arith.andi %168, %170 : vector<1x256xi1>
    %cst_68 = arith.constant 0.000000e+00 : f32
    %172 = vector.shape_cast %171 : vector<1x256xi1> to vector<1x256xi1>
    %173 = vector.broadcast %172 : vector<1x256xi1> to vector<16x256xi1>
    %174 = vector.broadcast %cst_68 : f32 to vector<16x256xf32>
    %175 = arith.select %173, %166, %174 : vector<16x256xi1>, vector<16x256xf32>
    %c16_i32_69 = arith.constant 16 : i32
    %176 = tpu.dynamic_rotate %164 by %c16_i32_69 dim 1 : vector<16x256xf32>, i32 -> vector<16x256xf32>
    %c16_i32_70 = arith.constant 16 : i32
    %177 = vector.broadcast %c16_i32_70 : i32 to vector<1x256xi32>
    %178 = arith.cmpi sge, %0, %177 : vector<1x256xi32>
    %cst_71 = arith.constant 0.000000e+00 : f32
    %179 = vector.shape_cast %178 : vector<1x256xi1> to vector<1x256xi1>
    %180 = vector.broadcast %179 : vector<1x256xi1> to vector<16x256xi1>
    %181 = vector.broadcast %cst_71 : f32 to vector<16x256xf32>
    %182 = arith.select %180, %176, %181 : vector<16x256xi1>, vector<16x256xf32>
    %c15_i32_72 = arith.constant 15 : i32
    %183 = tpu.dynamic_rotate %164 by %c15_i32_72 dim 1 : vector<16x256xf32>, i32 -> vector<16x256xf32>
    %c16_i32_73 = arith.constant 16 : i32
    %184 = vector.broadcast %c16_i32_73 : i32 to vector<1x256xi32>
    %185 = arith.cmpi sge, %0, %184 : vector<1x256xi32>
    %c15_i32_74 = arith.constant 15 : i32
    %186 = vector.broadcast %c15_i32_74 : i32 to vector<1x256xi32>
    %187 = arith.cmpi slt, %16, %186 : vector<1x256xi32>
    %188 = arith.andi %185, %187 : vector<1x256xi1>
    %cst_75 = arith.constant 0.000000e+00 : f32
    %189 = vector.shape_cast %188 : vector<1x256xi1> to vector<1x256xi1>
    %190 = vector.broadcast %189 : vector<1x256xi1> to vector<16x256xi1>
    %191 = vector.broadcast %cst_75 : f32 to vector<16x256xf32>
    %192 = arith.select %190, %183, %191 : vector<16x256xi1>, vector<16x256xf32>
    %c1_i32_76 = arith.constant 1 : i32
    %193 = tpu.dynamic_rotate %164 by %c1_i32_76 dim 1 : vector<16x256xf32>, i32 -> vector<16x256xf32>
    %c1_i32_77 = arith.constant 1 : i32
    %194 = vector.broadcast %c1_i32_77 : i32 to vector<1x256xi32>
    %195 = arith.cmpi sge, %16, %194 : vector<1x256xi32>
    %cst_78 = arith.constant 0.000000e+00 : f32
    %196 = vector.shape_cast %195 : vector<1x256xi1> to vector<1x256xi1>
    %197 = vector.broadcast %196 : vector<1x256xi1> to vector<16x256xi1>
    %198 = vector.broadcast %cst_78 : f32 to vector<16x256xf32>
    %199 = arith.select %197, %193, %198 : vector<16x256xi1>, vector<16x256xf32>
    %c255_i32_79 = arith.constant 255 : i32
    %200 = tpu.dynamic_rotate %164 by %c255_i32_79 dim 1 : vector<16x256xf32>, i32 -> vector<16x256xf32>
    %c15_i32_80 = arith.constant 15 : i32
    %201 = vector.broadcast %c15_i32_80 : i32 to vector<1x256xi32>
    %202 = arith.cmpi slt, %16, %201 : vector<1x256xi32>
    %cst_81 = arith.constant 0.000000e+00 : f32
    %203 = vector.shape_cast %202 : vector<1x256xi1> to vector<1x256xi1>
    %204 = vector.broadcast %203 : vector<1x256xi1> to vector<16x256xi1>
    %205 = vector.broadcast %cst_81 : f32 to vector<16x256xf32>
    %206 = arith.select %204, %200, %205 : vector<16x256xi1>, vector<16x256xf32>
    %c241_i32_82 = arith.constant 241 : i32
    %207 = tpu.dynamic_rotate %164 by %c241_i32_82 dim 1 : vector<16x256xf32>, i32 -> vector<16x256xf32>
    %c240_i32_83 = arith.constant 240 : i32
    %208 = vector.broadcast %c240_i32_83 : i32 to vector<1x256xi32>
    %209 = arith.cmpi slt, %0, %208 : vector<1x256xi32>
    %c1_i32_84 = arith.constant 1 : i32
    %210 = vector.broadcast %c1_i32_84 : i32 to vector<1x256xi32>
    %211 = arith.cmpi sge, %16, %210 : vector<1x256xi32>
    %212 = arith.andi %209, %211 : vector<1x256xi1>
    %cst_85 = arith.constant 0.000000e+00 : f32
    %213 = vector.shape_cast %212 : vector<1x256xi1> to vector<1x256xi1>
    %214 = vector.broadcast %213 : vector<1x256xi1> to vector<16x256xi1>
    %215 = vector.broadcast %cst_85 : f32 to vector<16x256xf32>
    %216 = arith.select %214, %207, %215 : vector<16x256xi1>, vector<16x256xf32>
    %c240_i32_86 = arith.constant 240 : i32
    %217 = tpu.dynamic_rotate %164 by %c240_i32_86 dim 1 : vector<16x256xf32>, i32 -> vector<16x256xf32>
    %c240_i32_87 = arith.constant 240 : i32
    %218 = vector.broadcast %c240_i32_87 : i32 to vector<1x256xi32>
    %219 = arith.cmpi slt, %0, %218 : vector<1x256xi32>
    %cst_88 = arith.constant 0.000000e+00 : f32
    %220 = vector.shape_cast %219 : vector<1x256xi1> to vector<1x256xi1>
    %221 = vector.broadcast %220 : vector<1x256xi1> to vector<16x256xi1>
    %222 = vector.broadcast %cst_88 : f32 to vector<16x256xf32>
    %223 = arith.select %221, %217, %222 : vector<16x256xi1>, vector<16x256xf32>
    %c239_i32_89 = arith.constant 239 : i32
    %224 = tpu.dynamic_rotate %164 by %c239_i32_89 dim 1 : vector<16x256xf32>, i32 -> vector<16x256xf32>
    %c240_i32_90 = arith.constant 240 : i32
    %225 = vector.broadcast %c240_i32_90 : i32 to vector<1x256xi32>
    %226 = arith.cmpi slt, %0, %225 : vector<1x256xi32>
    %c15_i32_91 = arith.constant 15 : i32
    %227 = vector.broadcast %c15_i32_91 : i32 to vector<1x256xi32>
    %228 = arith.cmpi slt, %16, %227 : vector<1x256xi32>
    %229 = arith.andi %226, %228 : vector<1x256xi1>
    %cst_92 = arith.constant 0.000000e+00 : f32
    %230 = vector.shape_cast %229 : vector<1x256xi1> to vector<1x256xi1>
    %231 = vector.broadcast %230 : vector<1x256xi1> to vector<16x256xi1>
    %232 = vector.broadcast %cst_92 : f32 to vector<16x256xf32>
    %233 = arith.select %231, %224, %232 : vector<16x256xi1>, vector<16x256xf32>
    %234 = tpu.concatenate %175, %182, %192, %199, %164, %206, %216, %223, %233 in 0 : vector<16x256xf32>, vector<16x256xf32>, vector<16x256xf32>, vector<16x256xf32>, vector<16x256xf32>, vector<16x256xf32>, vector<16x256xf32>, vector<16x256xf32>, vector<16x256xf32> -> vector<144x256xf32>
    %235 = arith.truncf %234 : vector<144x256xf32> to vector<144x256xbf16>
    %cst_93 = arith.constant dense<0.000000e+00> : vector<16x256xf32>
    %236 = tpu.matmul %165, %235, %cst_93 {dimension_numbers = #tpu.dot_dimension_numbers<[1], [0], [0], [1], [0, 0, 1, 1], [], []>} : vector<16x144xbf16>, vector<144x256xbf16>, vector<16x256xf32> -> vector<16x256xf32>
    %c0_94 = arith.constant 0 : index
    %c0_95 = arith.constant 0 : index
    %c0_96 = arith.constant 0 : index
    %237 = vector.load %arg7[%c0_94, %c0_95, %c0_96] : memref<1x64x256xf32, #tpu.memory_space<vmem>>, vector<1x16x256xf32>
    %238 = vector.shape_cast %237 : vector<1x16x256xf32> to vector<16x256xf32>
    %239 = vector.shape_cast %20 : vector<16x256xf32> to vector<1x16x256xf32>
    tpu.vector_store %arg7[%c0_94, %c0_95, %c0_96], %239 {strides = array<i32>} : memref<1x64x256xf32, #tpu.memory_space<vmem>>, vector<1x16x256xf32>,
    %c0_97 = arith.constant 0 : index
    %c16 = arith.constant 16 : index
    %c0_98 = arith.constant 0 : index
    %240 = vector.load %arg7[%c0_97, %c16, %c0_98] : memref<1x64x256xf32, #tpu.memory_space<vmem>>, vector<1x16x256xf32>
    %241 = vector.shape_cast %240 : vector<1x16x256xf32> to vector<16x256xf32>
    %242 = vector.shape_cast %92 : vector<16x256xf32> to vector<1x16x256xf32>
    tpu.vector_store %arg7[%c0_97, %c16, %c0_98], %242 {strides = array<i32>} : memref<1x64x256xf32, #tpu.memory_space<vmem>>, vector<1x16x256xf32>,
    %c0_99 = arith.constant 0 : index
    %c32 = arith.constant 32 : index
    %c0_100 = arith.constant 0 : index
    %243 = vector.load %arg7[%c0_99, %c32, %c0_100] : memref<1x64x256xf32, #tpu.memory_space<vmem>>, vector<1x16x256xf32>
    %244 = vector.shape_cast %243 : vector<1x16x256xf32> to vector<16x256xf32>
    %245 = vector.shape_cast %164 : vector<16x256xf32> to vector<1x16x256xf32>
    tpu.vector_store %arg7[%c0_99, %c32, %c0_100], %245 {strides = array<i32>} : memref<1x64x256xf32, #tpu.memory_space<vmem>>, vector<1x16x256xf32>,
    %c0_101 = arith.constant 0 : index
    %c48 = arith.constant 48 : index
    %c0_102 = arith.constant 0 : index
    %246 = vector.load %arg7[%c0_101, %c48, %c0_102] : memref<1x64x256xf32, #tpu.memory_space<vmem>>, vector<1x16x256xf32>
    %247 = vector.shape_cast %246 : vector<1x16x256xf32> to vector<16x256xf32>
    %248 = vector.shape_cast %236 : vector<16x256xf32> to vector<1x16x256xf32>
    tpu.vector_store %arg7[%c0_101, %c48, %c0_102], %248 {strides = array<i32>} : memref<1x64x256xf32, #tpu.memory_space<vmem>>, vector<1x16x256xf32>,
    %c0_103 = arith.constant 0 : index
    %c0_104 = arith.constant 0 : index
    %c0_105 = arith.constant 0 : index
    %249 = vector.load %arg7[%c0_103, %c0_104, %c0_105] : memref<1x64x256xf32, #tpu.memory_space<vmem>>, vector<1x64x256xf32>
    %250 = vector.shape_cast %249 : vector<1x64x256xf32> to vector<64x256xf32>
    %c0_106 = arith.constant 0 : index
    %c0_107 = arith.constant 0 : index
    %251 = vector.load %arg6[%c0_106, %c0_107] : memref<64x64xf32, #tpu.memory_space<vmem>>, vector<64x64xf32>
    %cst_108 = arith.constant dense<0.000000e+00> : vector<64x256xf32>
    %252 = tpu.matmul %251, %250, %cst_108 {dimension_numbers = #tpu.dot_dimension_numbers<[1], [0], [0], [1], [0, 0, 1, 1], [], []>} : vector<64x64xf32>, vector<64x256xf32>, vector<64x256xf32> -> vector<64x256xf32>
    %cst_109 = arith.constant dense<0.000000e+00> : vector<64xf32>
    %253 = vector.multi_reduction <add>, %252, %cst_109 [1] : vector<64x256xf32> to vector<64xf32>
    %254 = vector.shape_cast %253 : vector<64xf32> to vector<64x1xf32>
    %255 = arith.negf %254 : vector<64x1xf32>
    %256 = math.exp %255 : vector<64x1xf32>
    %cst_110 = arith.constant 1.000000e+00 : f32
    %257 = vector.broadcast %cst_110 : f32 to vector<64x1xf32>
    %258 = arith.addf %257, %256 : vector<64x1xf32>
    %259 = arith.divf %257, %258 : vector<64x1xf32>
    %260 = vector.broadcast %259 : vector<64x1xf32> to vector<64x256xf32>
    %261 = arith.mulf %250, %260 : vector<64x256xf32>
    %c0_111 = arith.constant 0 : index
    %c0_112 = arith.constant 0 : index
    %c0_113 = arith.constant 0 : index
    %262 = vector.load %arg7[%c0_111, %c0_112, %c0_113] : memref<1x64x256xf32, #tpu.memory_space<vmem>>, vector<1x64x256xf32>
    %263 = vector.shape_cast %262 : vector<1x64x256xf32> to vector<64x256xf32>
    %264 = vector.shape_cast %261 : vector<64x256xf32> to vector<1x64x256xf32>
    tpu.vector_store %arg7[%c0_111, %c0_112, %c0_113], %264 {strides = array<i32>} : memref<1x64x256xf32, #tpu.memory_space<vmem>>, vector<1x64x256xf32>,
    return
  }
  func.func @transform_0(%arg0: i32) -> (i32, i32, i32) {
    %c0_i32 = arith.constant 0 : i32
    %c0_i32_0 = arith.constant 0 : i32
    %c0_i32_1 = arith.constant 0 : i32
    return %arg0, %c0_i32, %c0_i32_0 : i32, i32, i32
  }
  func.func @transform_1(%arg0: i32) -> (i32, i32) {
    %c0_i32 = arith.constant 0 : i32
    %c0_i32_0 = arith.constant 0 : i32
    %c0_i32_1 = arith.constant 0 : i32
    return %c0_i32, %c0_i32_0 : i32, i32
  }
  func.func @transform_2(%arg0: i32) -> (i32, i32) {
    %c0_i32 = arith.constant 0 : i32
    %c0_i32_0 = arith.constant 0 : i32
    %c0_i32_1 = arith.constant 0 : i32
    return %c0_i32, %c0_i32_0 : i32, i32
  }
  func.func @transform_3(%arg0: i32) -> (i32, i32) {
    %c0_i32 = arith.constant 0 : i32
    %c0_i32_0 = arith.constant 0 : i32
    %c0_i32_1 = arith.constant 0 : i32
    return %c0_i32, %c0_i32_0 : i32, i32
  }
  func.func @transform_4(%arg0: i32) -> (i32, i32) {
    %c0_i32 = arith.constant 0 : i32
    %c0_i32_0 = arith.constant 0 : i32
    %c0_i32_1 = arith.constant 0 : i32
    return %c0_i32, %c0_i32_0 : i32, i32
  }
  func.func @transform_5(%arg0: i32) -> (i32, i32) {
    %c0_i32 = arith.constant 0 : i32
    %c0_i32_0 = arith.constant 0 : i32
    %c0_i32_1 = arith.constant 0 : i32
    return %c0_i32, %c0_i32_0 : i32, i32
  }
  func.func @transform_6(%arg0: i32) -> (i32, i32, i32) {
    %c0_i32 = arith.constant 0 : i32
    %c0_i32_0 = arith.constant 0 : i32
    %c0_i32_1 = arith.constant 0 : i32
    return %arg0, %c0_i32, %c0_i32_0 : i32, i32, i32
  }
}

</mosaic_0001>

<bundles_post_ra>
// kernel: my_conv2d_forward.1
= control target key start
LH: loop header
LB: loop body
LE: loop exit
PB: predicated region body
PF: predicated region fallthrough
CT: control target
= control target key end

     0   :  { %s2000_s21 = smov 0   ;;  %s2667_s0 = inlined_call_operand.vmem [shape: bf16[2,8,256], index: 0, kind: input, shape index: {}]   ;;  %s2668_s1 = inlined_call_operand.vmem [shape: bf16[16,8], index: 1, kind: input, shape index: {}]   ;;  %s2669_s2 = inlined_call_operand.vmem [shape: bf16[16,144], index: 2, kind: input, shape index: {}]   ;;  %s2670_s3 = inlined_call_operand.vmem [shape: bf16[16,144], index: 3, kind: input, shape index: {}]   ;;  %s2671_s4 = inlined_call_operand.vmem [shape: bf16[16,144], index: 4, kind: input, shape index: {}]   ;;  %s2672_s5 = inlined_call_operand.vmem [shape: f32[64,64], index: 5, kind: input, shape index: {}]   ;;  %s2673_s6 = inlined_call_operand.vmem [shape: f32[2,64,256], index: 6, kind: output, shape index: {}]  }
   0x1 LB: > { %s1447_s22 = sadd.s32 4294967295, %s1955_s21   ;;  %p1451_p0 = scmp.ge.s32.totalorder %s1955_s21, 1  ;;  %s1955_s21 = sphi %s2000_s21, %s16_s21  }
   0x2   : > { %p212_p1 = scmp.lt.s32.totalorder %s1955_s21, 3 }
   0x4   : > { %p213_p2 = pnand %p1451_p0, %p212_p1 }
   0x5   : > { %p242_p3 = scmp.lt.s32.totalorder (!%p213_p2), %s1447_s22, 1  ;;  %s1957_s9 = smov (!%p213_p2), 127  }
   0x6   : > { %216 = sbr.rel (%p213_p2) target bundleno = 1444 (0x5a4), region = 44  ;;  %s1958_s10 = smov (!%p213_p2), 113  }
   0x7   : > { %s1959_s11 = smov (!%p213_p2), 112   ;;  %s1960_s12 = smov (!%p213_p2), 15  }
   0x8   : > { %s1961_s13 = smov (!%p213_p2), 1   ;;  %s1962_s14 = smov (!%p213_p2), 16  }
   0x9   : > { %s1963_s15 = smov (!%p213_p2), 111   ;;  %s1964_s16 = smov (!%p213_p2), 17  }
   0xb   : > { %s2778_s22 = smov (!%p242_p3, %s1447_s22), 1  ;;  %vm297_vm0 = vcmask 1043456   ;;  %v1646_v7 = vld [vmem:[%s2668_s1] sm:$0xff]  ;;  %vm293_vm1 = vcmask 64512   ;;  %v253_v14 = vlaneseq  ;;  %v2688_v41 = vmov 0 }
   0xc   : > { %s1644_s23 = sshll.u32 %s2778_s22, 3  ;;  %s1645_s29 = sshll.u32 %s2778_s22, 7  ;;  %v1464_v36 = vld [vmem:[%s2669_s2] sm:$0xf]  ;;  %v1466_v53 = vld [vmem:[%s2669_s2 + $0x8] sm:$0xf0] }
   0xd   : > { %s246_s26 = scalar_lea.vmem %s2667_s0, %s1644_s23  ;;  %s2017_s8 = scalar_lea.vmem %s2673_s6, %s1645_s29  ;;  %v2055_v16 = vand.u32 127, %v253_v14 }
   0xe   : > { %v280_v0 = vld [vmem:[%s246_s26] sm:$0xff] }
   0xf   : > { %v289_v1 = vunpack.c.l.b16 %v280_v0  ;;  %v290_v2 = vunpack.c.h.b16 %v280_v0  ;;  %v2058_v19 = vadd.s32 128, %v2055_v16  ;;  %v260_v22 = vand.u32 15, %v2055_v16 }
  0x10   : > { %vm2679_vm2 = vcmp.lt.s32.totalorder %v2055_v16, 112  ;;  %vm2675_vm4 = vcmp.lt.s32.totalorder %v2055_v16, 113  ;;  %vm2674_vm5 = vcmp.lt.s32.totalorder %v2055_v16, 127 }
  0x11   : > { %v291_v3 = vpack.c.b16 %v289_v1, %v289_v1  ;;  %v292_v4 = vpack.c.b16 %v290_v2, %v290_v2  ;;  %v267_v20 = vand.u32 15, %v2058_v19  ;;  %vm463_vm3 = vcmp.lt.s32.totalorder %v2058_v19, 240 }
  0x12   : > { %vm2070_vm7 = vcmp.ge.s32.totalorder %v260_v22, 1  ;;  %vm2085_vm8 = vmpackc.low %vm463_vm3, %vm463_vm3  ;;  %vm2118_vm13 = vcmp.lt.s32.totalorder %v260_v22, 15 }
  0x13   : > { %v299_v5 = vsel %vm297_vm0, %v291_v3, 0  ;;  %v302_v6 = vsel %vm297_vm0, %v292_v4, 0  ;;  %vm2066_vm6 = vcmp.ge.s32.totalorder %v267_v20, 1  ;;  %v2689_v41 = vsel %vm2085_vm8, 4294967295, %v2688_v41  ;;  %vm2106_vm10 = vmpackc.low %vm2070_vm7, %vm2070_vm7 }
  0x14   : > { %311 = vmatpush.bf16.msra.mxu0 %v299_v5  ;;  %325 = vmatpush.bf16.msra.mxu1 %v302_v6  ;;  %vm465_vm9 = vmand %vm463_vm3, %vm2066_vm6  ;;  %vm2110_vm11 = vcmp.lt.s32.totalorder %v267_v20, 15  ;;  %vm2676_vm0 = vcmp.lt.s32.totalorder %v2055_v16, 1 }
  0x15   : > { %vm2114_vm12 = vmpackc.low %vm465_vm9, %vm465_vm9  ;;  %vm2682_vm9 = vcmp.lt.s32.totalorder %v2055_v16, 15 }
  0x16   : > { %vm2137_vm14 = vmpackc.low %vm2110_vm11, %vm2110_vm11 }
  0x17   : > { %1460 = vmatmul.msk.bf16.vlgmr.msra.gmra.mxu0 %vm293_vm1, %v1646_v7  ;;  %1461 = vmatmul.msk.bf16.vlgmr.msra.gmra.mxu1 %vm293_vm1, %v1646_v7  ;;  %vm2144_vm15 = vmpackc.low %vm2118_vm13, %vm2118_vm13  ;;  %vm347_vm1 = vcmp.ge.s32.totalorder %v2055_v16, 16 }
  0x94   : > { %v2019_v8 = vpop.f32.mrf.mxu0  ;;  %v2021_v9 = vpop.f32.mrf.mxu1 }
  0x95   : > { %1037 = vst [vmem:[%s2017_s8] sm:$0xff] %v2019_v8 }
  0x96   : > { %1038 = vst [vmem:[%s2017_s8 + $0x8] sm:$0xff] %v2021_v9 }
  0x9c   : > { %v2027_v10 = vpop.f32.mrf.mxu0  ;;  %v2029_v11 = vpop.f32.mrf.mxu1 }
  0x9d   : > { %1039 = vst [vmem:[%s2017_s8 + $0x10] sm:$0xff] %v2027_v10  ;;  %v1697_v12 = vpack.i.bf16 %v2027_v10, %v2019_v8  ;;  %v1702_v13 = vpack.i.bf16 %v2029_v11, %v2021_v9  ;;  %v527_v14 = vpack.c.bf16 %v2029_v11, %v2021_v9 }
  0x9e   : > { %1040 = vst [vmem:[%s2017_s8 + $0x18] sm:$0xff] %v2029_v11 }
  0x9f   : > { %1698 = vrot.lane.b32.xlu2 %v1697_v12, %s1957_s9  ;;  %1688 = vrot.lane.b32.xlu1 %v1697_v12, %s1958_s10 }
  0xa0   : > { %1678 = vrot.lane.b32.xlu0 %v1697_v12, %s1959_s11 }
  0xa7   : > { %1703 = vrot.lane.b32.xlu2 %v1702_v13, %s1957_s9  ;;  %1693 = vrot.lane.b32.xlu1 %v1702_v13, %s1958_s10 }
  0xa8   : > { %1683 = vrot.lane.b32.xlu0 %v1702_v13, %s1959_s11 }
  0xaf   : > { %1718 = vrot.lane.b32.xlu2 %v1697_v12, %s1960_s12  ;;  %1713 = vrot.lane.b32.xlu1 %v1702_v13, %s1961_s13 }
  0xb0   : > { %1708 = vrot.lane.b32.xlu0 %v1697_v12, %s1961_s13 }
  0xb7   : > { %1733 = vrot.lane.b32.xlu2 %v1702_v13, %s1962_s14  ;;  %1728 = vrot.lane.b32.xlu1 %v1697_v12, %s1962_s14 }
  0xb8   : > { %1723 = vrot.lane.b32.xlu0 %v1702_v13, %s1960_s12 }
  0xbf   : > { %1748 = vrot.lane.b32.xlu2 %v1697_v12, %s1963_s15  ;;  %1743 = vrot.lane.b32.xlu1 %v1702_v13, %s1964_s16 }
  0xc0   : > { %1738 = vrot.lane.b32.xlu0 %v1697_v12, %s1964_s16  ;;  %v526_v12 = vpack.c.bf16 %v2027_v10, %v2019_v8 }
  0xc8   : > { %1753 = vrot.lane.b32.xlu0 %v1702_v13, %s1963_s15 }
  0xf9   : > { %v1699_v15 = vpop.permute.xlu2 %1698 }
  0xfa   : > { %v1701_v42 = vunpack.i.h.bf16 %v1699_v15  ;;  %v1700_v43 = vunpack.i.l.bf16 %v1699_v15 }
 0x101   : > { %v1704_v21 = vpop.permute.xlu2 %1703 }
 0x102   : > { %v1706_v24 = vunpack.i.h.bf16 %v1704_v21  ;;  %v1705_v33 = vunpack.i.l.bf16 %v1704_v21 }
 0x104   : > { %v437_v56 = vsel %vm2674_vm5, %v1700_v43, %v1705_v33  ;;  %v438_v57 = vsel %vm2674_vm5, %v1701_v42, %v1706_v24  ;;  %v439_v61 = vsel %vm2674_vm5, %v1705_v33, %v1700_v43  ;;  %v440_v62 = vsel %vm2674_vm5, %v1706_v24, %v1701_v42  ;;  %vm2170_vm5 = vmpackc.low %vm2066_vm6, %vm2066_vm6 }
 0x105   : > { %v1474_v1 = vpack.c.bf16 %v438_v57, %v437_v56  ;;  %v1499_v2 = vpack.c.bf16 %v440_v62, %v439_v61 }
 0x109   : > { %v1719_v51 = vpop.permute.xlu2 %1718 }
 0x10a   : > { %v1721_v10 = vunpack.i.h.bf16 %v1719_v51  ;;  %v1720_v9 = vunpack.i.l.bf16 %v1719_v51 }
 0x111   : > { %v1689_v17 = vpop.permute.xlu1 %1688 }
 0x112   : > { %v1679_v18 = vpop.permute.xlu0 %1678  ;;  %v1691_v34 = vunpack.i.h.bf16 %v1689_v17  ;;  %v1690_v35 = vunpack.i.l.bf16 %v1689_v17 }
 0x113   : > { %v1681_v25 = vunpack.i.h.bf16 %v1679_v18  ;;  %v1680_v26 = vunpack.i.l.bf16 %v1679_v18  ;;  %v1734_v18 = vpop.permute.xlu2 %1733 }
 0x119   : > { %v1694_v23 = vpop.permute.xlu1 %1693 }
 0x11a   : > { %v1684_v27 = vpop.permute.xlu0 %1683  ;;  %v1696_v29 = vunpack.i.h.bf16 %v1694_v23  ;;  %v1695_v30 = vunpack.i.l.bf16 %v1694_v23 }
 0x11b   : > { %v1686_v31 = vunpack.i.h.bf16 %v1684_v27  ;;  %v1685_v32 = vunpack.i.l.bf16 %v1684_v27 }
 0x11c   : > { %v458_v46 = vsel %vm2675_vm4, %v1690_v35, %v1695_v30  ;;  %v459_v47 = vsel %vm2675_vm4, %v1691_v34, %v1696_v29  ;;  %v460_v48 = vsel %vm2675_vm4, %v1695_v30, %v1690_v35  ;;  %v461_v49 = vsel %vm2675_vm4, %v1696_v29, %v1691_v34 }
 0x11d   : > { %v483_v37 = vsel %vm2679_vm2, %v1680_v26, %v1685_v32  ;;  %v484_v38 = vsel %vm2679_vm2, %v1681_v25, %v1686_v31  ;;  %v485_v39 = vsel %vm2679_vm2, %v1685_v32, %v1680_v26  ;;  %v486_v40 = vsel %vm2679_vm2, %v1686_v31, %v1681_v25 }
 0x11e   : > { %v532_v44 = vpack.c.bf16 %v484_v38, %v483_v37  ;;  %v1493_v45 = vpack.c.bf16 %v486_v40, %v485_v39  ;;  %v1471_v59 = vpack.c.bf16 %v459_v47, %v458_v46  ;;  %v1496_v60 = vpack.c.bf16 %v461_v49, %v460_v48  ;;  %v1652_v48 = vld [vmem:[%s2671_s4 + $0x4] sm:$0xf0] }
 0x11f   : > { %vm2677_vm4 = vcmp.lt.s32.totalorder %v2055_v16, 16  ;;  %v1736_v25 = vunpack.i.h.bf16 %v1734_v18  ;;  %v1735_v26 = vunpack.i.l.bf16 %v1734_v18 }
 0x120   : > { %549 = vmatpush.bf16.msra.mxu2 %v532_v44  ;;  %1494 = vmatpush.bf16.msk.msrb.mxu0 %vm2085_vm8, %v1493_v45 }
 0x121   : > { %v1714_v52 = vpop.permute.xlu1 %1713 }
 0x122   : > { %v1709_v58 = vpop.permute.xlu0 %1708  ;;  %v1716_v3 = vunpack.i.h.bf16 %v1714_v52  ;;  %v1715_v4 = vunpack.i.l.bf16 %v1714_v52  ;;  %v1749_v52 = vpop.permute.xlu2 %1748 }
 0x123   : > { %v1711_v5 = vunpack.i.h.bf16 %v1709_v58  ;;  %v1710_v6 = vunpack.i.l.bf16 %v1709_v58  ;;  %v1751_v61 = vunpack.i.h.bf16 %v1749_v52 }
 0x124   : > { %1472 = vmatpush.bf16.msk.msra.mxu2 %vm2106_vm10, %v1471_v59  ;;  %1497 = vmatpush.bf16.msk.msrb.mxu0 %vm2114_vm12, %v1496_v60  ;;  %v1648_v59 = vld [vmem:[%s2669_s2 + $0x4] sm:$0xf0]  ;;  %v1570_v60 = vld [vmem:[%s2671_s4 + $0x8] sm:$0xf0] }
 0x125   : > { %v418_v15 = vsel %vm2676_vm0, %v1715_v4, %v1710_v6  ;;  %v419_v17 = vsel %vm2676_vm0, %v1716_v3, %v1711_v5  ;;  %v416_v22 = vsel %vm2676_vm0, %v1710_v6, %v1715_v4  ;;  %v417_v8 = vsel %vm2676_vm0, %v1711_v5, %v1716_v3  ;;  %vm397_vm0 = vmand %vm347_vm1, %vm2118_vm13 }
 0x126   : > { %v1477_v27 = vpack.c.bf16 %v419_v17, %v418_v15  ;;  %v1502_v29 = vpack.c.bf16 %v417_v8, %v416_v22  ;;  %vm2191_vm6 = vmpackc.low %vm397_vm0, %vm397_vm0  ;;  %vm2678_vm13 = vcmp.lt.s32.totalorder %v2055_v16, 17  ;;  %v1750_v3 = vunpack.i.l.bf16 %v1749_v52 }
 0x127   : > { %vm2211_vm0 = vmpackc.low %vm347_vm1, %vm347_vm1  ;;  %v1465_v6 = vor.u32 %v1648_v59, %v1464_v36 }
 0x128   : > { %1475 = vmatpush.bf16.msk.msra.mxu2 %vm2144_vm15, %v1474_v1  ;;  %1500 = vmatpush.bf16.msk.msrb.mxu0 %vm2137_vm14, %v1499_v2 }
 0x129   : > { %v1729_v7 = vpop.permute.xlu1 %1728 }
 0x12a   : > { %v1724_v13 = vpop.permute.xlu0 %1723  ;;  %v1731_v23 = vunpack.i.h.bf16 %v1729_v7  ;;  %v1730_v24 = vunpack.i.l.bf16 %v1729_v7  ;;  %v1647_v7 = vld [vmem:[%s2669_s2 + $0x4] sm:$0xf] }
 0x12b   : > { %v1726_v20 = vunpack.i.h.bf16 %v1724_v13  ;;  %v1725_v21 = vunpack.i.l.bf16 %v1724_v13 }
 0x12c   : > { %552 = vmatpush.bf16.msra.mxu2 %v526_v12  ;;  %580 = vmatpush.bf16.msrb.mxu0 %v527_v14  ;;  %v372_v35 = vsel %vm2677_vm4, %v1735_v26, %v1730_v24  ;;  %v373_v37 = vsel %vm2677_vm4, %v1736_v25, %v1731_v23  ;;  %v370_v42 = vsel %vm2677_vm4, %v1730_v24, %v1735_v26 }
 0x12d   : > { %v393_v28 = vsel %vm2682_vm9, %v1725_v21, %v1720_v9  ;;  %v394_v30 = vsel %vm2682_vm9, %v1726_v20, %v1721_v10  ;;  %v391_v31 = vsel %vm2682_vm9, %v1720_v9, %v1725_v21  ;;  %v392_v32 = vsel %vm2682_vm9, %v1721_v10, %v1726_v20 }
 0x12e   : > { %v1480_v39 = vpack.c.bf16 %v394_v30, %v393_v28  ;;  %v1505_v40 = vpack.c.bf16 %v392_v32, %v391_v31  ;;  %v371_v43 = vsel %vm2677_vm4, %v1731_v23, %v1736_v25  ;;  %v1483_v49 = vpack.c.bf16 %v373_v37, %v372_v35  ;;  %vm351_vm4 = vmand %vm347_vm1, %vm2070_vm7 }
 0x12f   : > { %v521_v51 = vpack.c.bf16 %v371_v43, %v370_v42  ;;  %vm2235_vm7 = vmpackc.low %vm351_vm4, %vm351_vm4  ;;  %vm2681_vm1 = vcmp.lt.s32.totalorder %v2055_v16, 111  ;;  %v1469_v20 = vor.u32 %v1647_v7, %v1466_v53  ;;  %vm2680_vm4 = vcmask 130048  }
 0x130   : > { %1478 = vmatpush.bf16.msk.msra.mxu2 %vm2106_vm10, %v1477_v27  ;;  %1503 = vmatpush.bf16.msk.msrb.mxu0 %vm2170_vm5, %v1502_v29 }
 0x131   : > { %v1744_v33 = vpop.permute.xlu1 %1743 }
 0x132   : > { %v1739_v38 = vpop.permute.xlu0 %1738  ;;  %v1746_v44 = vunpack.i.h.bf16 %v1744_v33  ;;  %v1745_v45 = vunpack.i.l.bf16 %v1744_v33 }
 0x133   : > { %v1741_v46 = vunpack.i.h.bf16 %v1739_v38  ;;  %v1740_v47 = vunpack.i.l.bf16 %v1739_v38 }
 0x134   : > { %1481 = vmatpush.bf16.msk.msra.mxu2 %vm2191_vm6, %v1480_v39  ;;  %1506 = vmatpush.bf16.msk.msrb.mxu0 %vm2137_vm14, %v1505_v40 }
 0x135   : > { %v345_v55 = vsel %vm2678_vm13, %v1745_v45, %v1740_v47  ;;  %v346_v56 = vsel %vm2678_vm13, %v1746_v44, %v1741_v46  ;;  %v343_v57 = vsel %vm2678_vm13, %v1740_v47, %v1745_v45  ;;  %v344_v58 = vsel %vm2678_vm13, %v1741_v46, %v1746_v44  ;;  %vm509_vm13 = vmand %vm463_vm3, %vm2110_vm11 }
 0x136   : > { %v1486_v1 = vpack.c.bf16 %v346_v56, %v345_v55  ;;  %v1508_v2 = vpack.c.bf16 %v344_v58, %v343_v57  ;;  %vm2262_vm3 = vmpackc.low %vm509_vm13, %vm509_vm13  ;;  %vm2712_vm11 = vcmp.lt.s32.totalorder %v2055_v16, 113 }
 0x137   : > { %vm2713_vm13 = vmmov %vm2712_vm11 }
 0x138   : > { %1484 = vmatpush.bf16.msk.msra.mxu2 %vm2211_vm0, %v1483_v49  ;;  %583 = vmatpush.bf16.msrb.mxu0 %v521_v51 }
 0x13a   : > { %v1754_v62 = vpop.permute.xlu0 %1753 }
 0x13b   : > { %v1756_v4 = vunpack.i.h.bf16 %v1754_v62  ;;  %v1755_v5 = vunpack.i.l.bf16 %v1754_v62 }
 0x13c   : > { %1487 = vmatpush.bf16.msk.msra.mxu2 %vm2235_vm7, %v1486_v1  ;;  %1509 = vmatpush.bf16.msk.msrb.mxu0 %vm2170_vm5, %v1508_v2 }
 0x13d   : > { %v504_v19 = vsel %vm2681_vm1, %v1750_v3, %v1755_v5  ;;  %v505_v12 = vsel %vm2681_vm1, %v1751_v61, %v1756_v4  ;;  %v506_v13 = vsel %vm2681_vm1, %v1755_v5, %v1750_v3  ;;  %v507_v14 = vsel %vm2681_vm1, %v1756_v4, %v1751_v61 }
 0x13e   : > { %v1489_v17 = vpack.c.bf16 %v505_v12, %v504_v19  ;;  %v1511_v18 = vpack.c.bf16 %v507_v14, %v506_v13  ;;  %vm2716_vm1 = vcmp.lt.s32.totalorder %v2055_v16, 127 }
 0x13f   : > { %557 = vmatmul.bf16.vlgmr.msra.gmra.mxu2 %v1465_v6  ;;  %585 = vmatmul.bf16.vlgmr.msrb.gmra.mxu0 %v1465_v6  ;;  %vm2717_vm9 = vmmov %vm2716_vm1 }
 0x140   : > { %1490 = vmatpush.bf16.msk.msra.mxu3 %vm2144_vm15, %v1489_v17  ;;  %1512 = vmatpush.bf16.msk.msrb.mxu1 %vm2262_vm3, %v1511_v18 }
 0x143   : > { %1491 = vmatmul.msk.bf16.vlgmr.msra.gmra.mxu3 %vm2680_vm4, %v1469_v20  ;;  %1513 = vmatmul.msk.bf16.vlgmr.msrb.gmra.mxu1 %vm2680_vm4, %v1469_v20 }
 0x1bc   : > { %v586_v21 = vpop.f32.mrf.mxu0 }
 0x1c0   : > { %v600_v22 = vpop.f32.mrf.mxu1 }
 0x1c1   : > { %v2272_v23 = vadd.f32 %v600_v22, %v586_v21 }
 0x1c2   : > { %v558_v8 = vpop.f32.mrf.mxu2 }
 0x1c4   : > { %v588_v9 = vpop.f32.mrf.mxu0 }
 0x1c6   : > { %v572_v10 = vpop.f32.mrf.mxu3 }
 0x1c7   : > { %v2279_v28 = vadd.f32 %v572_v10, %v558_v8 }
 0x1c8   : > { %v602_v24 = vpop.f32.mrf.mxu1 }
 0x1c9   : > { %v2274_v25 = vadd.f32 %v602_v24, %v588_v9 }
 0x1ca   : > { %v560_v27 = vpop.f32.mrf.mxu2 }
 0x1cb   : > { %v1757_v26 = vpack.i.bf16 %v2274_v25, %v2272_v23 }
 0x1cd   : > { %1758 = vrot.lane.b32.xlu2 %v1757_v26, %s1959_s11 }
 0x1ce   : > { %v574_v29 = vpop.f32.mrf.mxu3 }
 0x1cf   : > { %v2281_v30 = vadd.f32 %v574_v29, %v560_v27 }
 0x1d1   : > { %v1772_v31 = vpack.i.bf16 %v2281_v30, %v2279_v28  ;;  %v743_v24 = vpack.c.bf16 %v2281_v30, %v2279_v28 }
 0x1d3   : > { %1773 = vrot.lane.b32.xlu0 %v1772_v31, %s1958_s10  ;;  %1763 = vrot.lane.b32.xlu1 %v1772_v31, %s1959_s11 }
 0x1d5   : > { %1783 = vrot.lane.b32.xlu2 %v1772_v31, %s1957_s9 }
 0x1db   : > { %1778 = vrot.lane.b32.xlu0 %v1757_v26, %s1957_s9  ;;  %1768 = vrot.lane.b32.xlu1 %v1757_v26, %s1958_s10 }
 0x1dd   : > { %1788 = vrot.lane.b32.xlu2 %v1757_v26, %s1961_s13 }
 0x1e3   : > { %1803 = vrot.lane.b32.xlu0 %v1772_v31, %s1960_s12  ;;  %1793 = vrot.lane.b32.xlu1 %v1772_v31, %s1961_s13 }
 0x1e5   : > { %1813 = vrot.lane.b32.xlu2 %v1772_v31, %s1962_s14 }
 0x1eb   : > { %1808 = vrot.lane.b32.xlu0 %v1757_v26, %s1962_s14  ;;  %1798 = vrot.lane.b32.xlu1 %v1757_v26, %s1960_s12 }
 0x1ed   : > { %1818 = vrot.lane.b32.xlu2 %v1757_v26, %s1964_s16 }
 0x1f3   : > { %1828 = vrot.lane.b32.xlu0 %v1772_v31, %s1963_s15  ;;  %1823 = vrot.lane.b32.xlu1 %v1772_v31, %s1964_s16 }
 0x1fb   : > { %1833 = vrot.lane.b32.xlu1 %v1757_v26, %s1963_s15  ;;  %v744_v26 = vpack.c.bf16 %v2274_v25, %v2272_v23 }
 0x227   : > { %v1759_v32 = vpop.permute.xlu2 %1758 }
 0x228   : > { %v1761_v38 = vunpack.i.h.bf16 %v1759_v32  ;;  %v1760_v39 = vunpack.i.l.bf16 %v1759_v32 }
 0x22f   : > { %v1784_v33 = vpop.permute.xlu2 %1783 }
 0x230   : > { %v1786_v61 = vunpack.i.h.bf16 %v1784_v33  ;;  %v1785_v62 = vunpack.i.l.bf16 %v1784_v33 }
 0x237   : > { %v1789_v1 = vpop.permute.xlu2 %1788 }
 0x238   : > { %v1791_v8 = vunpack.i.h.bf16 %v1789_v1  ;;  %v1790_v10 = vunpack.i.l.bf16 %v1789_v1 }
 0x23f   : > { %v1814_v9 = vpop.permute.xlu2 %1813 }
 0x245   : > { %v1774_v35 = vpop.permute.xlu0 %1773  ;;  %v1764_v37 = vpop.permute.xlu1 %1763 }
 0x246   : > { %v1766_v40 = vunpack.i.h.bf16 %v1764_v37  ;;  %v1765_v42 = vunpack.i.l.bf16 %v1764_v37  ;;  %v1776_v51 = vunpack.i.h.bf16 %v1774_v35  ;;  %v1775_v52 = vunpack.i.l.bf16 %v1774_v35 }
 0x248   : > { %v711_v43 = vsel %vm2679_vm2, %v1765_v42, %v1760_v39  ;;  %v712_v44 = vsel %vm2679_vm2, %v1766_v40, %v1761_v38  ;;  %v713_v46 = vsel %vm2679_vm2, %v1760_v39, %v1765_v42  ;;  %v714_v47 = vsel %vm2679_vm2, %v1761_v38, %v1766_v40  ;;  %vm2714_vm2 = vmmov %vm2712_vm11 }
 0x249   : > { %v749_v45 = vpack.c.bf16 %v712_v44, %v711_v43  ;;  %v1545_v49 = vpack.c.bf16 %v714_v47, %v713_v46  ;;  %vm2715_vm4 = vmmov %vm2714_vm2  ;;  %v1816_v46 = vunpack.i.h.bf16 %v1814_v9  ;;  %v1815_v47 = vunpack.i.l.bf16 %v1814_v9 }
 0x24b   : > { %765 = vmatpush.bf16.msrb.mxu3 %v749_v45  ;;  %1546 = vmatpush.bf16.msk.msrb.mxu2 %vm2085_vm8, %v1545_v49  ;;  %vm2718_vm8 = vmmov %vm2716_vm1 }
 0x24d   : > { %v1779_v55 = vpop.permute.xlu0 %1778  ;;  %v1769_v56 = vpop.permute.xlu1 %1768 }
 0x24e   : > { %v1781_v57 = vunpack.i.h.bf16 %v1779_v55  ;;  %v1780_v58 = vunpack.i.l.bf16 %v1779_v55  ;;  %v1771_v36 = vunpack.i.h.bf16 %v1769_v56  ;;  %v1770_v59 = vunpack.i.l.bf16 %v1769_v56 }
 0x250   : > { %v695_v2 = vsel %vm2712_vm11, %v1775_v52, %v1770_v59  ;;  %v696_v3 = vsel %vm2713_vm13, %v1776_v51, %v1771_v36  ;;  %v697_v4 = vsel %vm2714_vm2, %v1770_v59, %v1775_v52  ;;  %v698_v5 = vsel %vm2715_vm4, %v1771_v36, %v1776_v51  ;;  %vm2719_vm11 = vmmov %vm2716_vm1 }
 0x251   : > { %v1523_v6 = vpack.c.bf16 %v696_v3, %v695_v2  ;;  %v1548_v7 = vpack.c.bf16 %v698_v5, %v697_v4  ;;  %v679_v53 = vsel %vm2716_vm1, %v1785_v62, %v1780_v58  ;;  %v680_v19 = vsel %vm2717_vm9, %v1786_v61, %v1781_v57 }
 0x252   : > { %v681_v12 = vsel %vm2718_vm8, %v1780_v58, %v1785_v62  ;;  %v682_v13 = vsel %vm2719_vm11, %v1781_v57, %v1786_v61  ;;  %v1526_v18 = vpack.c.bf16 %v680_v19, %v679_v53  ;;  %vm2720_vm2 = vcmp.lt.s32.totalorder %v2055_v16, 1  ;;  %v1819_v62 = vpop.permute.xlu2 %1818  ;;  %v1516_v53 = vld [vmem:[%s2670_s3] sm:$0xf]  ;;  %v1650_v19 = vld [vmem:[%s2670_s3 + $0x4] sm:$0xf0] }
 0x253   : > { %1524 = vmatpush.bf16.msk.msrb.mxu3 %vm2106_vm10, %v1523_v6  ;;  %1549 = vmatpush.bf16.msk.msrb.mxu2 %vm2114_vm12, %v1548_v7  ;;  %v1551_v20 = vpack.c.bf16 %v682_v13, %v681_v12  ;;  %vm2721_vm8 = vmmov %vm2720_vm2  ;;  %vm2724_vm4 = vcmp.lt.s32.totalorder %v2055_v16, 15  ;;  %v1821_v4 = vunpack.i.h.bf16 %v1819_v62  ;;  %v1820_v5 = vunpack.i.l.bf16 %v1819_v62 }
 0x254   : > { %vm2722_vm9 = vmmov %vm2720_vm2 }
 0x255   : > { %v1804_v14 = vpop.permute.xlu0 %1803  ;;  %v1794_v17 = vpop.permute.xlu1 %1793  ;;  %vm2723_vm1 = vmmov %vm2720_vm2 }
 0x256   : > { %v1796_v21 = vunpack.i.h.bf16 %v1794_v17  ;;  %v1795_v22 = vunpack.i.l.bf16 %v1794_v17  ;;  %v1806_v33 = vunpack.i.h.bf16 %v1804_v14  ;;  %v1805_v35 = vunpack.i.l.bf16 %v1804_v14  ;;  %vm2725_vm13 = vmmov %vm2724_vm4 }
 0x257   : > { %1527 = vmatpush.bf16.msk.msrb.mxu3 %vm2144_vm15, %v1526_v18  ;;  %1552 = vmatpush.bf16.msk.msrb.mxu2 %vm2137_vm14, %v1551_v20  ;;  %vm2726_vm11 = vmmov %vm2724_vm4 }
 0x258   : > { %v665_v27 = vsel %vm2720_vm2, %v1790_v10, %v1795_v22  ;;  %v666_v29 = vsel %vm2721_vm8, %v1791_v8, %v1796_v21  ;;  %v663_v31 = vsel %vm2722_vm9, %v1795_v22, %v1790_v10  ;;  %v664_v32 = vsel %vm2723_vm1, %v1796_v21, %v1791_v8  ;;  %vm2727_vm2 = vmmov %vm2724_vm4 }
 0x259   : > { %v1529_v39 = vpack.c.bf16 %v666_v29, %v665_v27  ;;  %v1554_v40 = vpack.c.bf16 %v664_v32, %v663_v31  ;;  %vm2728_vm8 = vcmp.lt.s32.totalorder %v2055_v16, 16  ;;  %v1517_v21 = vor.u32 %v1650_v19, %v1516_v53  ;;  %v1649_v27 = vld [vmem:[%s2670_s3 + $0x4] sm:$0xf]  ;;  %v1518_v29 = vld [vmem:[%s2670_s3 + $0x8] sm:$0xf0] }
 0x25a   : > { %vm2729_vm9 = vmmov %vm2728_vm8 }
 0x25b   : > { %768 = vmatpush.bf16.msrb.mxu3 %v743_v24  ;;  %796 = vmatpush.bf16.msrb.mxu2 %v744_v26  ;;  %vm2730_vm1 = vmmov %vm2728_vm8 }
 0x25d   : > { %v1809_v37 = vpop.permute.xlu0 %1808  ;;  %v1799_v38 = vpop.permute.xlu1 %1798 }
 0x25e   : > { %v1811_v42 = vunpack.i.h.bf16 %v1809_v37  ;;  %v1810_v43 = vunpack.i.l.bf16 %v1809_v37  ;;  %v1801_v44 = vunpack.i.h.bf16 %v1799_v38  ;;  %v1800_v45 = vunpack.i.l.bf16 %v1799_v38 }
 0x25f   : > { %1530 = vmatpush.bf16.msk.msrb.mxu3 %vm2106_vm10, %v1529_v39  ;;  %1555 = vmatpush.bf16.msk.msrb.mxu2 %vm2170_vm5, %v1554_v40  ;;  %v1521_v39 = vor.u32 %v1649_v27, %v1518_v29 }
 0x260   : > { %v649_v49 = vsel %vm2724_vm4, %v1800_v45, %v1805_v35  ;;  %v650_v51 = vsel %vm2725_vm13, %v1801_v44, %v1806_v33  ;;  %v647_v52 = vsel %vm2726_vm11, %v1805_v35, %v1800_v45  ;;  %v648_v55 = vsel %vm2727_vm2, %v1806_v33, %v1801_v44  ;;  %vm2731_vm4 = vmmov %vm2730_vm1 }
 0x261   : > { %v1532_v56 = vpack.c.bf16 %v650_v51, %v649_v49  ;;  %v1557_v57 = vpack.c.bf16 %v648_v55, %v647_v52  ;;  %v633_v58 = vsel %vm2728_vm8, %v1810_v43, %v1815_v47  ;;  %v634_v36 = vsel %vm2729_vm9, %v1811_v42, %v1816_v46 }
 0x262   : > { %v631_v59 = vsel %vm2730_vm1, %v1815_v47, %v1810_v43  ;;  %v632_v61 = vsel %vm2731_vm4, %v1816_v46, %v1811_v42  ;;  %v1535_v2 = vpack.c.bf16 %v634_v36, %v633_v58  ;;  %vm2732_vm13 = vcmp.lt.s32.totalorder %v2055_v16, 17 }
 0x263   : > { %1533 = vmatpush.bf16.msk.msrb.mxu3 %vm2191_vm6, %v1532_v56  ;;  %1558 = vmatpush.bf16.msk.msrb.mxu2 %vm2137_vm14, %v1557_v57  ;;  %v738_v3 = vpack.c.bf16 %v632_v61, %v631_v59  ;;  %vm2733_vm11 = vmmov %vm2732_vm13  ;;  %vm2736_vm9 = vcmp.lt.s32.totalorder %v2055_v16, 111 }
 0x264   : > { %vm2734_vm2 = vmmov %vm2733_vm11 }
 0x265   : > { %v1824_v1 = vpop.permute.xlu1 %1823  ;;  %vm2735_vm8 = vmmov %vm2734_vm2  ;;  %v1829_v22 = vpop.permute.xlu0 %1828 }
 0x266   : > { %v1826_v6 = vunpack.i.h.bf16 %v1824_v1  ;;  %v1825_v7 = vunpack.i.l.bf16 %v1824_v1  ;;  %v1831_v10 = vunpack.i.h.bf16 %v1829_v22  ;;  %v1830_v9 = vunpack.i.l.bf16 %v1829_v22  ;;  %vm2737_vm1 = vmmov %vm2736_vm9 }
 0x267   : > { %1536 = vmatpush.bf16.msk.msrb.mxu3 %vm2211_vm0, %v1535_v2  ;;  %799 = vmatpush.bf16.msrb.mxu2 %v738_v3  ;;  %vm2738_vm4 = vmmov %vm2737_vm1 }
 0x268   : > { %v617_v12 = vsel %vm2732_vm13, %v1820_v5, %v1825_v7  ;;  %v618_v13 = vsel %vm2733_vm11, %v1821_v4, %v1826_v6  ;;  %v615_v14 = vsel %vm2734_vm2, %v1825_v7, %v1820_v5  ;;  %v616_v17 = vsel %vm2735_vm8, %v1826_v6, %v1821_v4  ;;  %vm2739_vm13 = vmmov %vm2737_vm1 }
 0x269   : > { %v1538_v18 = vpack.c.bf16 %v618_v13, %v617_v12  ;;  %v1560_v20 = vpack.c.bf16 %v616_v17, %v615_v14  ;;  %vm2740_vm11 = vcmask 130048   ;;  %vm2742_vm8 = vcmp.lt.s32.totalorder %v2055_v16, 112 }
 0x26a   : > { %vm2741_vm2 = vmmov %vm2740_vm11 }
 0x26b   : > { %1539 = vmatpush.bf16.msk.msrb.mxu3 %vm2235_vm7, %v1538_v18  ;;  %1561 = vmatpush.bf16.msk.msrb.mxu2 %vm2170_vm5, %v1560_v20 }
 0x26d   : > { %v1834_v8 = vpop.permute.xlu1 %1833 }
 0x26e   : > { %v1836_v24 = vunpack.i.h.bf16 %v1834_v8  ;;  %v1835_v26 = vunpack.i.l.bf16 %v1834_v8  ;;  %773 = vmatmul.bf16.vlgmr.msrb.gmra.mxu3 %v1517_v21  ;;  %801 = vmatmul.bf16.vlgmr.msrb.gmra.mxu2 %v1517_v21 }
 0x270   : > { %v728_v31 = vsel %vm2736_vm9, %v1831_v10, %v1836_v24  ;;  %v730_v32 = vsel %vm2737_vm1, %v1836_v24, %v1831_v10  ;;  %v727_v33 = vsel %vm2738_vm4, %v1830_v9, %v1835_v26  ;;  %v729_v35 = vsel %vm2739_vm13, %v1835_v26, %v1830_v9  ;;  %vm2743_vm9 = vmmov %vm2742_vm8 }
 0x271   : > { %v1541_v37 = vpack.c.bf16 %v728_v31, %v727_v33  ;;  %v1563_v38 = vpack.c.bf16 %v730_v32, %v729_v35  ;;  %vm2744_vm1 = vmmov %vm2742_vm8  ;;  %vm2746_vm13 = vcmp.lt.s32.totalorder %v2055_v16, 113 }
 0x272   : > { %vm2745_vm4 = vmmov %vm2744_vm1 }
 0x273   : > { %1542 = vmatpush.bf16.msk.msra.mxu1 %vm2144_vm15, %v1541_v37  ;;  %1564 = vmatpush.bf16.msk.msra.mxu0 %vm2262_vm3, %v1563_v38 }
 0x276   : > { %1543 = vmatmul.msk.bf16.vlgmr.msra.gmra.mxu1 %vm2740_vm11, %v1521_v39  ;;  %1565 = vmatmul.msk.bf16.vlgmr.msra.gmra.mxu0 %vm2741_vm2, %v1521_v39  ;;  %vm2747_vm11 = vmmov %vm2746_vm13 }
 0x277   : > { %vm2748_vm2 = vmmov %vm2747_vm11 }
 0x2f1   : > { %v774_v40 = vpop.f32.mrf.mxu3  ;;  %v802_v42 = vpop.f32.mrf.mxu2 }
 0x2f3   : > { %v788_v43 = vpop.f32.mrf.mxu1  ;;  %v816_v44 = vpop.f32.mrf.mxu0 }
 0x2f4   : > { %v2410_v51 = vadd.f32 %v788_v43, %v774_v40  ;;  %v2412_v52 = vadd.f32 %v816_v44, %v802_v42 }
 0x2f9   : > { %v776_v45 = vpop.f32.mrf.mxu3  ;;  %v804_v46 = vpop.f32.mrf.mxu2 }
 0x2fb   : > { %v790_v47 = vpop.f32.mrf.mxu1  ;;  %v818_v49 = vpop.f32.mrf.mxu0 }
 0x2fc   : > { %v2414_v55 = vadd.f32 %v790_v47, %v776_v45  ;;  %v2416_v56 = vadd.f32 %v818_v49, %v804_v46 }
 0x2fe   : > { %v1842_v57 = vpack.i.bf16 %v2416_v56, %v2412_v52  ;;  %v1847_v58 = vpack.i.bf16 %v2414_v55, %v2410_v51  ;;  %v959_v46 = vpack.c.bf16 %v2414_v55, %v2410_v51  ;;  %v960_v47 = vpack.c.bf16 %v2416_v56, %v2412_v52 }
 0x300   : > { %1843 = vrot.lane.b32.xlu0 %v1842_v57, %s1959_s11  ;;  %1848 = vrot.lane.b32.xlu1 %v1847_v58, %s1958_s10 }
 0x301   : > { %1838 = vrot.lane.b32.xlu2 %v1847_v58, %s1959_s11 }
 0x308   : > { %1858 = vrot.lane.b32.xlu0 %v1847_v58, %s1957_s9  ;;  %1863 = vrot.lane.b32.xlu1 %v1842_v57, %s1957_s9 }
 0x309   : > { %1853 = vrot.lane.b32.xlu2 %v1842_v57, %s1958_s10 }
 0x310   : > { %1873 = vrot.lane.b32.xlu0 %v1842_v57, %s1961_s13  ;;  %1878 = vrot.lane.b32.xlu1 %v1847_v58, %s1960_s12 }
 0x311   : > { %1868 = vrot.lane.b32.xlu2 %v1847_v58, %s1961_s13 }
 0x318   : > { %1888 = vrot.lane.b32.xlu0 %v1847_v58, %s1962_s14  ;;  %1893 = vrot.lane.b32.xlu1 %v1842_v57, %s1962_s14 }
 0x319   : > { %1883 = vrot.lane.b32.xlu2 %v1842_v57, %s1960_s12 }
 0x320   : > { %1903 = vrot.lane.b32.xlu0 %v1842_v57, %s1964_s16  ;;  %1908 = vrot.lane.b32.xlu1 %v1847_v58, %s1963_s15 }
 0x321   : > { %1898 = vrot.lane.b32.xlu2 %v1847_v58, %s1964_s16 }
 0x329   : > { %1913 = vrot.lane.b32.xlu2 %v1842_v57, %s1963_s15 }
 0x35b   : > { %v1839_v36 = vpop.permute.xlu2 %1838 }
 0x35c   : > { %v1841_v61 = vunpack.i.h.bf16 %v1839_v36  ;;  %v1840_v62 = vunpack.i.l.bf16 %v1839_v36 }
 0x363   : > { %v1854_v59 = vpop.permute.xlu2 %1853 }
 0x364   : > { %v1856_v53 = vunpack.i.h.bf16 %v1854_v59  ;;  %v1855_v19 = vunpack.i.l.bf16 %v1854_v59 }
 0x36b   : > { %v1869_v3 = vpop.permute.xlu2 %1868 }
 0x36c   : > { %v1871_v54 = vunpack.i.h.bf16 %v1869_v3  ;;  %v1870_v43 = vunpack.i.l.bf16 %v1869_v3 }
 0x372   : > { %v1844_v1 = vpop.permute.xlu0 %1843  ;;  %v1849_v2 = vpop.permute.xlu1 %1848 }
 0x373   : > { %v1846_v4 = vunpack.i.h.bf16 %v1844_v1  ;;  %v1845_v5 = vunpack.i.l.bf16 %v1844_v1  ;;  %v1851_v6 = vunpack.i.h.bf16 %v1849_v2  ;;  %v1850_v7 = vunpack.i.l.bf16 %v1849_v2  ;;  %v1884_v35 = vpop.permute.xlu2 %1883 }
 0x374   : > { %v1886_v59 = vunpack.i.h.bf16 %v1884_v35 }
 0x375   : > { %v927_v12 = vsel %vm2742_vm8, %v1840_v62, %v1845_v5  ;;  %v928_v13 = vsel %vm2743_vm9, %v1841_v61, %v1846_v4  ;;  %v929_v14 = vsel %vm2744_vm1, %v1845_v5, %v1840_v62  ;;  %v930_v17 = vsel %vm2745_vm4, %v1846_v4, %v1841_v61  ;;  %vm2749_vm8 = vmmov %vm2748_vm2 }
 0x376   : > { %v965_v18 = vpack.c.bf16 %v928_v13, %v927_v12  ;;  %v1597_v20 = vpack.c.bf16 %v930_v17, %v929_v14  ;;  %v911_v21 = vsel %vm2746_vm13, %v1850_v7, %v1855_v19  ;;  %v912_v22 = vsel %vm2747_vm11, %v1851_v6, %v1856_v53 }
 0x377   : > { %v913_v8 = vsel %vm2748_vm2, %v1855_v19, %v1850_v7  ;;  %v914_v10 = vsel %vm2749_vm8, %v1856_v53, %v1851_v6  ;;  %vm2750_vm9 = vnez %v2689_v41  ;;  %v1575_v9 = vpack.c.bf16 %v912_v22, %v911_v21 }
 0x378   : > { %981 = vmatpush.bf16.msra.mxu3 %v965_v18  ;;  %1598 = vmatpush.bf16.msk.msrb.mxu0 %vm2750_vm9, %v1597_v20  ;;  %v1600_v24 = vpack.c.bf16 %v914_v10, %v913_v8  ;;  %vm2751_vm1 = vcmp.lt.s32.totalorder %v2055_v16, 127  ;;  %v1885_v61 = vunpack.i.l.bf16 %v1884_v35 }
 0x379   : > { %vm2752_vm4 = vmmov %vm2751_vm1 }
 0x37a   : > { %v1859_v26 = vpop.permute.xlu0 %1858  ;;  %v1864_v27 = vpop.permute.xlu1 %1863  ;;  %vm2753_vm13 = vmmov %vm2751_vm1 }
 0x37b   : > { %v1861_v29 = vunpack.i.h.bf16 %v1859_v26  ;;  %v1860_v31 = vunpack.i.l.bf16 %v1859_v26  ;;  %v1866_v32 = vunpack.i.h.bf16 %v1864_v27  ;;  %v1865_v33 = vunpack.i.l.bf16 %v1864_v27  ;;  %vm2754_vm11 = vmmov %vm2751_vm1  ;;  %v1899_v6 = vpop.permute.xlu2 %1898 }
 0x37c   : > { %1576 = vmatpush.bf16.msk.msra.mxu3 %vm2106_vm10, %v1575_v9  ;;  %1601 = vmatpush.bf16.msk.msrb.mxu0 %vm2114_vm12, %v1600_v24  ;;  %vm2755_vm12 = vcmp.lt.s32.totalorder %v2055_v16, 1  ;;  %v1901_v34 = vunpack.i.h.bf16 %v1899_v6 }
 0x37d   : > { %v896_v37 = vsel %vm2751_vm1, %v1861_v29, %v1866_v32  ;;  %v898_v41 = vsel %vm2752_vm4, %v1866_v32, %v1861_v29  ;;  %v895_v38 = vsel %vm2753_vm13, %v1860_v31, %v1865_v33  ;;  %v897_v39 = vsel %vm2754_vm11, %v1865_v33, %v1860_v31  ;;  %vm2756_vm2 = vmmov %vm2755_vm12 }
 0x37e   : > { %v1578_v40 = vpack.c.bf16 %v896_v37, %v895_v38  ;;  %v1603_v42 = vpack.c.bf16 %v898_v41, %v897_v39  ;;  %vm2757_vm8 = vmmov %vm2756_vm2  ;;  %vm2759_vm1 = vcmp.lt.s32.totalorder %v2055_v16, 15  ;;  %v1900_v29 = vunpack.i.l.bf16 %v1899_v6  ;;  %v2565_v6 = vld [vmem:[%s2017_s8 + $0x10] sm:$0xff] }
 0x37f   : > { %vm2758_vm9 = vmmov %vm2756_vm2 }
 0x380   : > { %1579 = vmatpush.bf16.msk.msra.mxu3 %vm2144_vm15, %v1578_v40  ;;  %1604 = vmatpush.bf16.msk.msrb.mxu0 %vm2137_vm14, %v1603_v42  ;;  %vm2760_vm4 = vmmov %vm2759_vm1  ;;  %v1568_v40 = vld [vmem:[%s2671_s4] sm:$0xf] }
 0x381   : > { %vm2761_vm13 = vmmov %vm2759_vm1 }
 0x382   : > { %v1874_v44 = vpop.permute.xlu0 %1873  ;;  %v1879_v45 = vpop.permute.xlu1 %1878  ;;  %vm2762_vm11 = vmmov %vm2759_vm1 }
 0x383   : > { %v1876_v49 = vunpack.i.h.bf16 %v1874_v44  ;;  %v1875_v57 = vunpack.i.l.bf16 %v1874_v44  ;;  %v1881_v58 = vunpack.i.h.bf16 %v1879_v45  ;;  %v1880_v36 = vunpack.i.l.bf16 %v1879_v45  ;;  %v1914_v63 = vpop.permute.xlu2 %1913 }
 0x384   : > { %984 = vmatpush.bf16.msra.mxu3 %v959_v46  ;;  %1012 = vmatpush.bf16.msrb.mxu0 %v960_v47  ;;  %v1916_v38 = vunpack.i.h.bf16 %v1914_v63  ;;  %v1915_v39 = vunpack.i.l.bf16 %v1914_v63 }
 0x385   : > { %v879_v62 = vsel %vm2755_vm12, %v1870_v43, %v1875_v57  ;;  %v880_v1 = vsel %vm2756_vm2, %v1871_v54, %v1876_v49  ;;  %v881_v2 = vsel %vm2757_vm8, %v1875_v57, %v1870_v43  ;;  %v882_v3 = vsel %vm2758_vm9, %v1876_v49, %v1871_v54 }
 0x386   : > { %v1581_v4 = vpack.c.bf16 %v882_v3, %v881_v2  ;;  %v1606_v5 = vpack.c.bf16 %v880_v1, %v879_v62  ;;  %v863_v7 = vsel %vm2759_vm1, %v1880_v36, %v1885_v61  ;;  %v864_v53 = vsel %vm2760_vm4, %v1881_v58, %v1886_v59 }
 0x387   : > { %v865_v19 = vsel %vm2761_vm13, %v1885_v61, %v1880_v36  ;;  %v866_v12 = vsel %vm2762_vm11, %v1886_v59, %v1881_v58  ;;  %v1609_v14 = vpack.c.bf16 %v864_v53, %v863_v7  ;;  %vm2763_vm12 = vcmp.lt.s32.totalorder %v2055_v16, 16  ;;  %v1069_v7 = vld [vmem:[%s2672_s5] sm:$0xff] }
 0x388   : > { %1582 = vmatpush.bf16.msk.msra.mxu3 %vm2106_vm10, %v1581_v4  ;;  %1607 = vmatpush.bf16.msk.msrb.mxu0 %vm2170_vm5, %v1606_v5  ;;  %v1584_v13 = vpack.c.bf16 %v866_v12, %v865_v19  ;;  %vm2764_vm10 = vmmov %vm2763_vm12  ;;  %vm2771_vm1 = vcmp.lt.s32.totalorder %v2055_v16, 111  ;;  %v1569_v59 = vor.u32 %v1652_v48, %v1568_v40  ;;  %v2573_v12 = vld [vmem:[%s2017_s8] sm:$0xff] }
 0x389   : > { %vm2765_vm2 = vmmov %vm2764_vm10 }
 0x38a   : > { %v1889_v17 = vpop.permute.xlu0 %1888  ;;  %v1894_v18 = vpop.permute.xlu1 %1893  ;;  %vm2766_vm8 = vmmov %vm2765_vm2 }
 0x38b   : > { %v1891_v20 = vunpack.i.h.bf16 %v1889_v17  ;;  %v1890_v21 = vunpack.i.l.bf16 %v1889_v17  ;;  %v1896_v22 = vunpack.i.h.bf16 %v1894_v18  ;;  %v1895_v8 = vunpack.i.l.bf16 %v1894_v18  ;;  %vm2772_vm4 = vmmov %vm2771_vm1  ;;  %v1070_v18 = vld [vmem:[%s2672_s5 + $0x8] sm:$0xff] }
 0x38c   : > { %1585 = vmatpush.bf16.msk.msra.mxu3 %vm2191_vm6, %v1584_v13  ;;  %1610 = vmatpush.bf16.msk.msrb.mxu0 %vm2137_vm14, %v1609_v14  ;;  %vm2767_vm14 = vcmp.lt.s32.totalorder %v2055_v16, 17  ;;  %vm2773_vm13 = vmmov %vm2771_vm1  ;;  %v1651_v16 = vld [vmem:[%s2671_s4 + $0x4] sm:$0xf]  ;;  %v1072_v14 = vld [vmem:[%s2672_s5 + $0x18] sm:$0xff] }
 0x38d   : > { %v850_v50 = vsel %vm2763_vm12, %v1896_v22, %v1891_v20  ;;  %v849_v10 = vsel %vm2764_vm10, %v1895_v8, %v1890_v21  ;;  %v847_v9 = vsel %vm2765_vm2, %v1890_v21, %v1895_v8  ;;  %v848_v24 = vsel %vm2766_vm8, %v1891_v20, %v1896_v22  ;;  %vm2768_vm6 = vmmov %vm2767_vm14  ;;  %v1073_v20 = vld [vmem:[%s2672_s5 + $0x20] sm:$0xff]  ;;  %v2601_v21 = vld [vmem:[%s2017_s8 + $0x18] sm:$0xff] }
 0x38e   : > { %v1587_v26 = vpack.c.bf16 %v850_v50, %v849_v10  ;;  %v954_v27 = vpack.c.bf16 %v848_v24, %v847_v9  ;;  %vm2774_vm11 = vmmov %vm2771_vm1  ;;  %v1573_v62 = vor.u32 %v1651_v16, %v1570_v60  ;;  %v1071_v22 = vld [vmem:[%s2672_s5 + $0x10] sm:$0xff]  ;;  %v2608_v8 = vld [vmem:[%s2017_s8 + $0x8] sm:$0xff] }
 0x38f   : > { %v1074_v50 = vld [vmem:[%s2672_s5 + $0x28] sm:$0xff]  ;;  %v1075_v10 = vld [vmem:[%s2672_s5 + $0x30] sm:$0xff]  ;;  %v1076_v9 = vld [vmem:[%s2672_s5 + $0x38] sm:$0xff] }
 0x390   : > { %1588 = vmatpush.bf16.msk.msra.mxu3 %vm2211_vm0, %v1587_v26  ;;  %1015 = vmatpush.bf16.msrb.mxu0 %v954_v27  ;;  %vm2769_vm0 = vmmov %vm2768_vm6 }
 0x391   : > { %vm2770_vm9 = vmmov %vm2769_vm0 }
 0x392   : > { %v1904_v31 = vpop.permute.xlu0 %1903  ;;  %v1909_v32 = vpop.permute.xlu1 %1908 }
 0x393   : > { %v1906_v33 = vunpack.i.h.bf16 %v1904_v31  ;;  %v1905_v35 = vunpack.i.l.bf16 %v1904_v31  ;;  %v1911_v37 = vunpack.i.h.bf16 %v1909_v32  ;;  %v1910_v41 = vunpack.i.l.bf16 %v1909_v32 }
 0x395   : > { %v831_v42 = vsel %vm2767_vm14, %v1900_v29, %v1905_v35  ;;  %v832_v54 = vsel %vm2768_vm6, %v1901_v34, %v1906_v33  ;;  %v833_v43 = vsel %vm2769_vm0, %v1905_v35, %v1900_v29  ;;  %v834_v44 = vsel %vm2770_vm9, %v1906_v33, %v1901_v34 }
 0x396   : > { %v1590_v45 = vpack.c.bf16 %v834_v44, %v833_v43  ;;  %v1612_v46 = vpack.c.bf16 %v832_v54, %v831_v42  ;;  %v943_v47 = vsel %vm2771_vm1, %v1910_v41, %v1915_v39  ;;  %v944_v49 = vsel %vm2772_vm4, %v1911_v37, %v1916_v38 }
 0x397   : > { %v945_v57 = vsel %vm2773_vm13, %v1915_v39, %v1910_v41  ;;  %v946_v58 = vsel %vm2774_vm11, %v1916_v38, %v1911_v37  ;;  %v1593_v36 = vpack.c.bf16 %v944_v49, %v943_v47 }
 0x398   : > { %1591 = vmatpush.bf16.msk.msra.mxu3 %vm2235_vm7, %v1590_v45  ;;  %1613 = vmatpush.bf16.msk.msrb.mxu0 %vm2170_vm5, %v1612_v46  ;;  %v1615_v61 = vpack.c.bf16 %v946_v58, %v945_v57  ;;  %vm2775_vm7 = vcmask 130048  }
 0x399   : > { %vm2776_vm5 = vmmov %vm2775_vm7 }
 0x39b   : > { %989 = vmatmul.bf16.vlgmr.msra.gmra.mxu3 %v1569_v59  ;;  %1017 = vmatmul.bf16.vlgmr.msrb.gmra.mxu0 %v1569_v59 }
 0x39c   : > { %1594 = vmatpush.bf16.msk.msrb.mxu3 %vm2144_vm15, %v1593_v36  ;;  %vm1077_vm15 = vcmask 523264  }
 0x3a0   : > { %1616 = vmatpush.bf16.msk.msra.mxu3 %vm2262_vm3, %v1615_v61 }
 0x3ab   : > { %1595 = vmatmul.msk.bf16.vlgmr.msrb.gmra.mxu3 %vm2775_vm7, %v1573_v62 }
 0x3bb   : > { %1617 = vmatmul.msk.bf16.vlgmr.msra.gmra.mxu3 %vm2776_vm5, %v1573_v62 }
 0x418   : > { %v1018_v4 = vpop.f32.mrf.mxu0 }
 0x41e   : > { %v990_v0 = vpop.f32.mrf.mxu3 }
 0x420   : > { %v1020_v53 = vpop.f32.mrf.mxu0 }
 0x426   : > { %v992_v11 = vpop.f32.mrf.mxu3 }
 0x42e   : > { %v1004_v1 = vpop.f32.mrf.mxu3 }
 0x42f   : > { %v2550_v15 = vadd.f32 %v1004_v1, %v990_v0 }
 0x436   : > { %v1006_v2 = vpop.f32.mrf.mxu3 }
 0x437   : > { %v2548_v3 = vadd.f32 %v1006_v2, %v992_v11 }
 0x439   : > { %1110 = vmatpush.msra.mxu0 %v2548_v3  ;;  %1653 = vmatpush.msra.mxu2 %v2548_v3 }
 0x43b   : > { %1111 = vmatpush.msra.mxu0 %v2550_v15  ;;  %1654 = vmatpush.msra.mxu2 %v2550_v15 }
 0x43d   : > { %1112 = vmatpush.msra.mxu0 %v2414_v55  ;;  %1655 = vmatpush.msra.mxu2 %v2414_v55 }
 0x43e   : > { %v1032_v5 = vpop.f32.mrf.mxu3 }
 0x43f   : > { %1113 = vmatpush.msra.mxu0 %v2410_v51  ;;  %1656 = vmatpush.msra.mxu2 %v2410_v51  ;;  %v2583_v17 = vadd.f32 %v1032_v5, %v1018_v4 }
 0x441   : > { %1114 = vmatpush.msra.mxu0 %v2281_v30  ;;  %1657 = vmatpush.msra.mxu2 %v2281_v30 }
 0x443   : > { %1115 = vmatpush.msra.mxu0 %v2279_v28  ;;  %1658 = vmatpush.msra.mxu2 %v2279_v28 }
 0x445   : > { %1116 = vmatpush.msra.mxu0 %v2565_v6  ;;  %1659 = vmatpush.msra.mxu2 %v2565_v6 }
 0x446   : > { %v1034_v19 = vpop.f32.mrf.mxu3 }
 0x447   : > { %v2575_v13 = vadd.f32 %v1034_v19, %v1020_v53  ;;  %1117 = vmatpush.msra.mxu0 %v2573_v12  ;;  %1660 = vmatpush.msra.mxu2 %v2573_v12 }
 0x448   : > { %1618 = vmatmul.msk.f32.vlgmr.msra.gmra.mxu0 %vm1077_vm15, %v1069_v7  ;;  %1621 = vmatmul.msk.f32.vlgmr.msra.gmra.mxu2 %vm1077_vm15, %v1072_v14 }
 0x449   : > { %1151 = vmatpush.msrb.mxu1 %v2575_v13 }
 0x44b   : > { %1152 = vmatpush.msrb.mxu1 %v2583_v17 }
 0x44d   : > { %1153 = vmatpush.msrb.mxu1 %v2416_v56 }
 0x44f   : > { %1154 = vmatpush.msrb.mxu1 %v2412_v52 }
 0x450   : > { %1619 = vmatmul.msk.f32.gmra.mxu0 %vm1077_vm15, %v1070_v18  ;;  %1622 = vmatmul.msk.f32.gmra.mxu2 %vm1077_vm15, %v1073_v20 }
 0x451   : > { %1155 = vmatpush.msrb.mxu1 %v2274_v25 }
 0x453   : > { %1156 = vmatpush.msrb.mxu1 %v2272_v23 }
 0x455   : > { %1157 = vmatpush.msrb.mxu1 %v2601_v21 }
 0x457   : > { %1158 = vmatpush.msrb.mxu1 %v2608_v8 }
 0x458   : > { %1626 = vmatmul.msk.f32.vlgmr.msrb.gmra.mxu1 %vm1077_vm15, %v1069_v7  ;;  %1620 = vmatmul.msk.f32.gmra.mxu0 %vm1077_vm15, %v1071_v22 }
 0x459   : > { %1623 = vmatmul.msk.f32.gmra.mxu2 %vm1077_vm15, %v1074_v50 }
 0x460   : > { %1627 = vmatmul.msk.f32.gmra.mxu1 %vm1077_vm15, %v1070_v18 }
 0x461   : > { %1624 = vmatmul.msk.f32.gmra.mxu2 %vm1077_vm15, %v1075_v10 }
 0x468   : > { %1628 = vmatmul.msk.f32.gmra.mxu1 %vm1077_vm15, %v1071_v22 }
 0x469   : > { %1625 = vmatmul.msk.f32.gmra.mxu2 %vm1077_vm15, %v1076_v9 }
 0x470   : > { %1629 = vmatmul.msk.f32.gmra.mxu1 %vm1077_vm15, %v1072_v14 }
 0x478   : > { %1630 = vmatmul.msk.f32.gmra.mxu1 %vm1077_vm15, %v1073_v20 }
 0x480   : > { %1631 = vmatmul.msk.f32.gmra.mxu1 %vm1077_vm15, %v1074_v50 }
 0x488   : > { %1632 = vmatmul.msk.f32.gmra.mxu1 %vm1077_vm15, %v1075_v10 }
 0x490   : > { %1633 = vmatmul.msk.f32.gmra.mxu1 %vm1077_vm15, %v1076_v9 }
 0x4c5   : > { %v1119_v24 = vpop.f32.mrf.mxu0 }
 0x4cb   : > { %v1128_v32 = vpop.f32.mrf.mxu2 }
 0x4cd   : > { %v1122_v63 = vpop.f32.mrf.mxu0 }
 0x4d3   : > { %v1131_v41 = vpop.f32.mrf.mxu2 }
 0x4d5   : > { %v1160_v26 = vpop.f32.mrf.mxu1  ;;  %v1125_v31 = vpop.f32.mrf.mxu0 }
 0x4d6   : > { %v1184_v27 = vadd.f32 %v1160_v26, %v1119_v24 }
 0x4d8   : > { %1185 = vadd.xlane.f32.xlu0 %v1184_v27 }
 0x4dc   : > { %v1134_v48 = vpop.f32.mrf.mxu2 }
 0x4dd   : > { %v1163_v34 = vpop.f32.mrf.mxu1 }
 0x4de   : > { %v1187_v29 = vadd.f32 %v1163_v34, %v1122_v63 }
 0x4e0   : > { %1188 = vadd.xlane.f32.xlu1 %v1187_v29 }
 0x4e4   : > { %v1137_v43 = vpop.f32.mrf.mxu2 }
 0x4e5   : > { %v1166_v33 = vpop.f32.mrf.mxu1 }
 0x4e6   : > { %v1190_v35 = vadd.f32 %v1166_v33, %v1125_v31 }
 0x4e8   : > { %1191 = vadd.xlane.f32.xlu2 %v1190_v35 }
 0x4ec   : > { %v1140_v46 = vpop.f32.mrf.mxu2 }
 0x4ed   : > { %v1169_v37 = vpop.f32.mrf.mxu1 }
 0x4ee   : > { %v1193_v38 = vadd.f32 %v1169_v37, %v1128_v32 }
 0x4f0   : > { %1194 = vadd.xlane.f32.xlu2 %v1193_v38 }
 0x4f5   : > { %v1172_v39 = vpop.f32.mrf.mxu1 }
 0x4f6   : > { %v1196_v40 = vadd.f32 %v1172_v39, %v1131_v41 }
 0x4f8   : > { %1197 = vadd.xlane.f32.xlu0 %v1196_v40 }
 0x4fd   : > { %v1175_v42 = vpop.f32.mrf.mxu1 }
 0x4fe   : > { %v1199_v54 = vadd.f32 %v1175_v42, %v1134_v48 }
 0x500   : > { %1200 = vadd.xlane.f32.xlu1 %v1199_v54 }
 0x505   : > { %v1178_v44 = vpop.f32.mrf.mxu1 }
 0x506   : > { %v1202_v45 = vadd.f32 %v1178_v44, %v1137_v43 }
 0x508   : > { %1203 = vadd.xlane.f32.xlu2 %v1202_v45 }
 0x50d   : > { %v1181_v47 = vpop.f32.mrf.mxu1 }
 0x50e   : > { %v1205_v49 = vadd.f32 %v1181_v47, %v1140_v46 }
 0x510   : > { %1206 = vadd.xlane.f32.xlu0 %v1205_v49 }
 0x54b   : > { %v1186_v57 = vpop.xlane.xlu0 %1185 }
 0x54c   : > { %v1634_v58 = vmul.f32 -1.442695, %v1186_v57 }
 0x54e   : > { %1917 = vpow2.f32 %v1634_v58 }
 0x553   : > { %v1189_v36 = vpop.xlane.xlu1 %1188 }
 0x554   : > { %v1918_v59 = vpop.eup %1917  ;;  %v1635_v61 = vmul.f32 -1.442695, %v1189_v36 }
 0x555   : > { %v1232_v16 = vadd.f32 1.0, %v1918_v59 }
 0x556   : > { %1919 = vpow2.f32 %v1635_v61 }
 0x557   : > { %1921 = vrcp.f32 %v1232_v16  ;;  %v1251_v5 = vand.u32 2147483648, %v1232_v16  ;;  %v1249_v53 = vand.u32 2147483647, %v1232_v16  ;;  %vm1245_vm12 = vweird.f32 %v1232_v16 }
 0x559   : > { %v1252_v50 = vor.u32 1.1754944e-38, %v1251_v5  ;;  %vm1250_vm2 = vcmp.eq.f32.partialorder %v1249_v53, 8.507059e+37 }
 0x55b   : > { %v1192_v60 = vpop.xlane.xlu2 %1191 }
 0x55c   : > { %v1920_v62 = vpop.eup %1919  ;;  %v1636_v0 = vmul.f32 -1.442695, %v1192_v60 }
 0x55d   : > { %v1922_v11 = vpop.eup %1921  ;;  %v1233_v1 = vadd.f32 1.0, %v1920_v62 }
 0x55e   : > { %v1241_v2 = vmul.f32 %v1922_v11, %v1232_v16  ;;  %1923 = vpow2.f32 %v1636_v0  ;;  %vm1246_vm3 = vweird.f32 %v1922_v11 }
 0x55f   : > { %1925 = vrcp.f32 %v1233_v1  ;;  %vm1247_vm10 = vmor %vm1245_vm12, %vm1246_vm3  ;;  %v1266_v29 = vand.u32 2147483648, %v1233_v1  ;;  %v1264_v32 = vand.u32 2147483647, %v1233_v1  ;;  %vm1260_vm14 = vweird.f32 %v1233_v1 }
 0x560   : > { %v1242_v4 = vsub.f32 1.0, %v1241_v2 }
 0x561   : > { %v1267_v39 = vor.u32 1.1754944e-38, %v1266_v29  ;;  %vm1265_vm0 = vcmp.eq.f32.partialorder %v1264_v32, 8.507059e+37 }
 0x562   : > { %v1243_v7 = vmul.f32 %v1922_v11, %v1242_v4 }
 0x563   : > { %v1195_v19 = vpop.xlane.xlu2 %1194 }
 0x564   : > { %v1924_v14 = vpop.eup %1923  ;;  %v1244_v18 = vadd.f32 %v1922_v11, %v1243_v7  ;;  %v1637_v20 = vmul.f32 -1.442695, %v1195_v19 }
 0x565   : > { %v1926_v22 = vpop.eup %1925  ;;  %v1234_v10 = vadd.f32 1.0, %v1924_v14 }
 0x566   : > { %v1248_v9 = vsel %vm1247_vm10, %v1922_v11, %v1244_v18  ;;  %v1256_v24 = vmul.f32 %v1926_v22, %v1233_v1  ;;  %1927 = vpow2.f32 %v1637_v20  ;;  %vm1261_vm8 = vweird.f32 %v1926_v22 }
 0x567   : > { %v1253_v26 = vsel %vm1250_vm2, %v1252_v50, %v1248_v9  ;;  %1929 = vrcp.f32 %v1234_v10  ;;  %vm1262_vm6 = vmor %vm1260_vm14, %vm1261_vm8  ;;  %v1281_v44 = vand.u32 2147483648, %v1234_v10  ;;  %v1279_v46 = vand.u32 2147483647, %v1234_v10 }
 0x568   : > { %v1360_v27 = vmul.f32 %v1253_v26, %v2573_v12  ;;  %v1361_v63 = vmul.f32 %v1253_v26, %v2608_v8  ;;  %v1257_v34 = vsub.f32 1.0, %v1256_v24  ;;  %vm1275_vm1 = vweird.f32 %v1234_v10 }
 0x569   : > { %v1282_v59 = vor.u32 1.1754944e-38, %v1281_v44  ;;  %vm1280_vm13 = vcmp.eq.f32.partialorder %v1279_v46, 8.507059e+37 }
 0x56a   : > { %1376 = vst [vmem:[%s2017_s8] sm:$0xff] %v1360_v27  ;;  %v1258_v31 = vmul.f32 %v1926_v22, %v1257_v34 }
 0x56b   : > { %1377 = vst [vmem:[%s2017_s8 + $0x8] sm:$0xff] %v1361_v63  ;;  %v1198_v33 = vpop.xlane.xlu0 %1197 }
 0x56c   : > { %v1928_v35 = vpop.eup %1927  ;;  %v1259_v37 = vadd.f32 %v1926_v22, %v1258_v31  ;;  %v1638_v41 = vmul.f32 -1.442695, %v1198_v33 }
 0x56d   : > { %v1930_v38 = vpop.eup %1929  ;;  %v1235_v12 = vadd.f32 1.0, %v1928_v35 }
 0x56e   : > { %v1263_v40 = vsel %vm1262_vm6, %v1926_v22, %v1259_v37  ;;  %v1271_v8 = vmul.f32 %v1930_v38, %v1234_v10  ;;  %1931 = vpow2.f32 %v1638_v41  ;;  %vm1276_vm9 = vweird.f32 %v1930_v38 }
 0x56f   : > { %v1268_v48 = vsel %vm1265_vm0, %v1267_v39, %v1263_v40  ;;  %1933 = vrcp.f32 %v1235_v12  ;;  %vm1277_vm4 = vmor %vm1275_vm1, %vm1276_vm9  ;;  %v1296_v11 = vand.u32 2147483648, %v1235_v12  ;;  %v1294_v2 = vand.u32 2147483647, %v1235_v12 }
 0x570   : > { %v1362_v42 = vmul.f32 %v1268_v48, %v2565_v6  ;;  %v1363_v54 = vmul.f32 %v1268_v48, %v2601_v21  ;;  %v1272_v43 = vsub.f32 1.0, %v1271_v8  ;;  %vm1290_vm7 = vweird.f32 %v1235_v12 }
 0x571   : > { %v1297_v14 = vor.u32 1.1754944e-38, %v1296_v11  ;;  %vm1295_vm15 = vcmp.eq.f32.partialorder %v1294_v2, 8.507059e+37 }
 0x572   : > { %1378 = vst [vmem:[%s2017_s8 + $0x10] sm:$0xff] %v1362_v42  ;;  %v1273_v45 = vmul.f32 %v1930_v38, %v1272_v43 }
 0x573   : > { %1379 = vst [vmem:[%s2017_s8 + $0x18] sm:$0xff] %v1363_v54  ;;  %v1201_v47 = vpop.xlane.xlu1 %1200 }
 0x574   : > { %v1932_v49 = vpop.eup %1931  ;;  %v1274_v57 = vadd.f32 %v1930_v38, %v1273_v45  ;;  %v1639_v58 = vmul.f32 -1.442695, %v1201_v47 }
 0x575   : > { %v1934_v36 = vpop.eup %1933  ;;  %v1236_v6 = vadd.f32 1.0, %v1932_v49 }
 0x576   : > { %v1278_v61 = vsel %vm1277_vm4, %v1930_v38, %v1274_v57  ;;  %v1286_v21 = vmul.f32 %v1934_v36, %v1235_v12  ;;  %1935 = vpow2.f32 %v1639_v58  ;;  %vm1291_vm11 = vweird.f32 %v1934_v36 }
 0x577   : > { %v1283_v16 = vsel %vm1280_vm13, %v1282_v59, %v1278_v61  ;;  %1937 = vrcp.f32 %v1236_v6  ;;  %vm1292_vm5 = vmor %vm1290_vm7, %vm1291_vm11  ;;  %v1311_v9 = vand.u32 2147483648, %v1236_v6  ;;  %v1309_v26 = vand.u32 2147483647, %v1236_v6 }
 0x578   : > { %v1364_v60 = vmul.f32 %v1283_v16, %v2279_v28  ;;  %v1365_v62 = vmul.f32 %v1283_v16, %v2272_v23  ;;  %v1287_v0 = vsub.f32 1.0, %v1286_v21  ;;  %vm1305_vm12 = vweird.f32 %v1236_v6 }
 0x579   : > { %v1312_v32 = vor.u32 1.1754944e-38, %v1311_v9  ;;  %vm1310_vm2 = vcmp.eq.f32.partialorder %v1309_v26, 8.507059e+37 }
 0x57a   : > { %1380 = vst [vmem:[%s2017_s8 + $0x20] sm:$0xff] %v1364_v60  ;;  %v1288_v1 = vmul.f32 %v1934_v36, %v1287_v0 }
 0x57b   : > { %1381 = vst [vmem:[%s2017_s8 + $0x28] sm:$0xff] %v1365_v62  ;;  %v1204_v4 = vpop.xlane.xlu2 %1203 }
 0x57c   : > { %v1936_v5 = vpop.eup %1935  ;;  %v1289_v7 = vadd.f32 %v1934_v36, %v1288_v1  ;;  %v1640_v53 = vmul.f32 -1.442695, %v1204_v4 }
 0x57d   : > { %v1938_v19 = vpop.eup %1937  ;;  %v1237_v28 = vadd.f32 1.0, %v1936_v5 }
 0x57e   : > { %v1293_v18 = vsel %vm1292_vm5, %v1934_v36, %v1289_v7  ;;  %v1301_v23 = vmul.f32 %v1938_v19, %v1236_v6  ;;  %1939 = vpow2.f32 %v1640_v53  ;;  %vm1306_vm3 = vweird.f32 %v1938_v19 }
 0x57f   : > { %v1298_v20 = vsel %vm1295_vm15, %v1297_v14, %v1293_v18  ;;  %1941 = vrcp.f32 %v1237_v28  ;;  %vm1307_vm10 = vmor %vm1305_vm12, %vm1306_vm3  ;;  %v1326_v39 = vand.u32 2147483648, %v1237_v28  ;;  %v1324_v40 = vand.u32 2147483647, %v1237_v28 }
 0x580   : > { %v1366_v22 = vmul.f32 %v1298_v20, %v2281_v30  ;;  %v1367_v50 = vmul.f32 %v1298_v20, %v2274_v25  ;;  %v1302_v10 = vsub.f32 1.0, %v1301_v23  ;;  %vm1320_vm14 = vweird.f32 %v1237_v28 }
 0x581   : > { %v1327_v54 = vor.u32 1.1754944e-38, %v1326_v39  ;;  %vm1325_vm0 = vcmp.eq.f32.partialorder %v1324_v40, 8.507059e+37 }
 0x582   : > { %1382 = vst [vmem:[%s2017_s8 + $0x30] sm:$0xff] %v1366_v22  ;;  %v1303_v24 = vmul.f32 %v1938_v19, %v1302_v10 }
 0x583   : > { %1383 = vst [vmem:[%s2017_s8 + $0x38] sm:$0xff] %v1367_v50  ;;  %v1207_v27 = vpop.xlane.xlu0 %1206 }
 0x584   : > { %v1940_v63 = vpop.eup %1939  ;;  %v1304_v34 = vadd.f32 %v1938_v19, %v1303_v24  ;;  %v1641_v29 = vmul.f32 -1.442695, %v1207_v27 }
 0x585   : > { %v1942_v31 = vpop.eup %1941  ;;  %v1238_v30 = vadd.f32 1.0, %v1940_v63 }
 0x586   : > { %v1308_v33 = vsel %vm1307_vm10, %v1938_v19, %v1304_v34  ;;  %v1316_v25 = vmul.f32 %v1942_v31, %v1237_v28  ;;  %1943 = vpow2.f32 %v1641_v29  ;;  %vm1321_vm8 = vweird.f32 %v1942_v31 }
 0x587   : > { %v1313_v35 = vsel %vm1310_vm2, %v1312_v32, %v1308_v33  ;;  %1945 = vrcp.f32 %v1238_v30  ;;  %vm1322_vm6 = vmor %vm1320_vm14, %vm1321_vm8  ;;  %v1341_v49 = vand.u32 2147483648, %v1238_v30  ;;  %v1339_v58 = vand.u32 2147483647, %v1238_v30 }
 0x588   : > { %v1368_v37 = vmul.f32 %v1313_v35, %v2410_v51  ;;  %v1369_v41 = vmul.f32 %v1313_v35, %v2412_v52  ;;  %v1317_v38 = vsub.f32 1.0, %v1316_v25  ;;  %vm1335_vm1 = vweird.f32 %v1238_v30 }
 0x589   : > { %v1342_v6 = vor.u32 1.1754944e-38, %v1341_v49  ;;  %vm1340_vm13 = vcmp.eq.f32.partialorder %v1339_v58, 8.507059e+37 }
 0x58a   : > { %1384 = vst [vmem:[%s2017_s8 + $0x40] sm:$0xff] %v1368_v37  ;;  %v1318_v12 = vmul.f32 %v1942_v31, %v1317_v38 }
 0x58b   : > { %1385 = vst [vmem:[%s2017_s8 + $0x48] sm:$0xff] %v1369_v41 }
 0x58c   : > { %v1944_v8 = vpop.eup %1943  ;;  %v1319_v48 = vadd.f32 %v1942_v31, %v1318_v12 }
 0x58d   : > { %v1946_v42 = vpop.eup %1945  ;;  %v1239_v43 = vadd.f32 1.0, %v1944_v8 }
 0x58e   : > { %v1323_v44 = vsel %vm1322_vm6, %v1942_v31, %v1319_v48  ;;  %v1331_v51 = vmul.f32 %v1946_v42, %v1238_v30  ;;  %vm1336_vm9 = vweird.f32 %v1946_v42 }
 0x58f   : > { %v1328_v52 = vsel %vm1325_vm0, %v1327_v54, %v1323_v44  ;;  %1947 = vrcp.f32 %v1239_v43  ;;  %vm1337_vm4 = vmor %vm1335_vm1, %vm1336_vm9  ;;  %v1356_v62 = vand.u32 2147483648, %v1239_v43  ;;  %v1354_v11 = vand.u32 2147483647, %v1239_v43 }
 0x590   : > { %v1370_v45 = vmul.f32 %v1328_v52, %v2414_v55  ;;  %v1371_v46 = vmul.f32 %v1328_v52, %v2416_v56  ;;  %v1332_v47 = vsub.f32 1.0, %v1331_v51  ;;  %vm1350_vm7 = vweird.f32 %v1239_v43 }
 0x591   : > { %v1357_v2 = vor.u32 1.1754944e-38, %v1356_v62  ;;  %vm1355_vm15 = vcmp.eq.f32.partialorder %v1354_v11, 8.507059e+37 }
 0x592   : > { %1386 = vst [vmem:[%s2017_s8 + $0x50] sm:$0xff] %v1370_v45  ;;  %v1333_v57 = vmul.f32 %v1946_v42, %v1332_v47 }
 0x593   : > { %1387 = vst [vmem:[%s2017_s8 + $0x58] sm:$0xff] %v1371_v46 }
 0x594   : > { %v1334_v36 = vadd.f32 %v1946_v42, %v1333_v57 }
 0x595   : > { %v1948_v59 = vpop.eup %1947 }
 0x596   : > { %v1338_v61 = vsel %vm1337_vm4, %v1946_v42, %v1334_v36  ;;  %v1346_v21 = vmul.f32 %v1948_v59, %v1239_v43  ;;  %vm1351_vm11 = vweird.f32 %v1948_v59 }
 0x597   : > { %v1343_v55 = vsel %vm1340_vm13, %v1342_v6, %v1338_v61  ;;  %vm1352_vm5 = vmor %vm1350_vm7, %vm1351_vm11 }
 0x598   : > { %v1372_v56 = vmul.f32 %v1343_v55, %v2550_v15  ;;  %v1373_v16 = vmul.f32 %v1343_v55, %v2583_v17  ;;  %v1347_v60 = vsub.f32 1.0, %v1346_v21 }
 0x59a   : > { %1388 = vst [vmem:[%s2017_s8 + $0x60] sm:$0xff] %v1372_v56  ;;  %v1348_v0 = vmul.f32 %v1948_v59, %v1347_v60 }
 0x59b   : > { %1389 = vst [vmem:[%s2017_s8 + $0x68] sm:$0xff] %v1373_v16 }
 0x59c   : > { %v1349_v1 = vadd.f32 %v1948_v59, %v1348_v0 }
 0x59e   : > { %v1353_v4 = vsel %vm1352_vm5, %v1948_v59, %v1349_v1 }
 0x59f   : > { %v1358_v5 = vsel %vm1355_vm15, %v1357_v2, %v1353_v4 }
 0x5a0   : > { %v1374_v15 = vmul.f32 %v1358_v5, %v2548_v3  ;;  %v1375_v17 = vmul.f32 %v1358_v5, %v2575_v13 }
 0x5a2   : > { %1390 = vst [vmem:[%s2017_s8 + $0x70] sm:$0xff] %v1374_v15 }
 0x5a3   : > { %1391 = vst [vmem:[%s2017_s8 + $0x78] sm:$0xff] %v1375_v17 }
 0x5a4 PF: > { %s16_s21 = sadd.s32 1, %s1955_s21  }
 0x5a5   : > { %p13_p4 = scmp.ge.s32.totalorder %s16_s21, 4  }
 0x5a7   :  { %15 = sbr.rel (!%p13_p4) target bundleno = 1 (0x1), region = 74 }

</bundles_post_ra>
